<compile_context>
chip_gen: v5e
topology: v5e:2x2
jax: 0.10.0
libtpu: 0.0.40
codegen_flags: <defaults>
</compile_context>

<pallas_src>
import jax
import jax.numpy as jnp
from jax.experimental import pallas as pl
from jax.experimental.pallas import tpu as pltpu

FEATURES = 4
HIDDEN = 32
OUT = 3
OUT_PAD = 128              # lane-dense final output width (sliced to OUT outside)

FUSED_ALIGN = 256          # padding granularity for the A-resident fused path
FUSED_MAX_N_PAD = 3072     # bf16 A_hat <= 18 MiB -> fits every generation's VMEM
                           # (conservative so the fused kernel also fits v7x's
                           #  64 MiB/TC even with a compiler-side value copy of A)
TILE_ROW = 512             # streamed-path A row tile
_VMEM_LIMIT_CAP = 56 << 20 # explicit scoped-VMEM request, fits v5e/v6e/v7x physical


def _device_kind():
    try:
        return jax.devices()[0].device_kind.lower()
    except Exception:
        return ""


_DEVICE_KIND = _device_kind()
# v7x: 2 TensorCores/chip and ~2.3x the HBM BW of v6e -> bigger k-tiles + try
# CORE_PARALLEL row sharding there.
_IS_MULTI_TC = ("v7" in _DEVICE_KIND) or ("tpu7" in _DEVICE_KIND)
_MAX_TILE_K = 4096 if _IS_MULTI_TC else 2048


def _round_up(n, m):
    return ((n + m - 1) // m) * m


def _pick_tile_k(n_pad, max_tile_k):
    for t in (4096, 2048, 1024, 512):
        if t <= max_tile_k and n_pad % t == 0:
            return t
    return TILE_ROW


# ----------------------------------------------------------------------------
# Kernels
# ----------------------------------------------------------------------------
def prologue_kernel(x_ref, w1_ref, b1_ref, wg1_ref, m_ref):
    """M1 = relu(X @ W_fc1 + b_fc1) @ Wg1  (row-tiled, no cross-node mixing)."""
    h = jnp.dot(x_ref[...], w1_ref[...], preferred_element_type=jnp.float32)
    h = jnp.maximum(h + b1_ref[...], 0.0)
    m_ref[...] = jnp.dot(h, wg1_ref[...],
                         preferred_element_type=jnp.float32).astype(m_ref.dtype)


def gcn_agg_stream_kernel(a_ref, m_ref, bg_ref, wnext_ref, bnext_ref,
                          out_ref, acc_ref):
    """Streamed GCN layer + fused next-layer transform.

    A_hat streams in (TILE_ROW, tile_k) blocks (reduction axis last); M is a
    VMEM-resident full block and is sliced in-kernel (no re-streaming of M
    per row block).
    """
    k = pl.program_id(1)

    @pl.when(k == 0)
    def _():
        acc_ref[...] = jnp.zeros_like(acc_ref)

    tile_k = a_ref.shape[1]
    start = pl.multiple_of(k * tile_k, tile_k)
    m_k = m_ref[pl.ds(start, tile_k), :]
    acc_ref[...] += jnp.dot(a_ref[...], m_k, preferred_element_type=jnp.float32)

    @pl.when(k == pl.num_programs(1) - 1)
    def _():
        h = jnp.maximum(acc_ref[...] + bg_ref[...], 0.0)
        out_ref[...] = (jnp.dot(h, wnext_ref[...],
                                preferred_element_type=jnp.float32)
                        + bnext_ref[...]).astype(out_ref.dtype)


def fused_net_kernel(a_hbm, x_ref, w1_ref, b1_ref,
                     wg1_ref, bg1_ref, wg2_ref, bg2_ref, wg3_ref, bg3_ref,
                     w2_ref, b2_ref, out_ref, a_vmem, copy_sem):
    """Whole network in one kernel: A_hat is copied HBM->VMEM exactly once and
    reused by all three aggregation layers (vs. streaming it 3x from HBM)."""
    cp = pltpu.make_async_copy(a_hbm, a_vmem, copy_sem)
    cp.start()                       # overlap the one A_hat DMA with the prologue

    h = jnp.dot(x_ref[...], w1_ref[...], preferred_element_type=jnp.float32)
    h = jnp.maximum(h + b1_ref[...], 0.0)
    m = jnp.dot(h, wg1_ref[...],
                preferred_element_type=jnp.float32).astype(jnp.bfloat16)

    cp.wait()
    a = a_vmem[...]                  # bf16, VMEM-resident for all 3 layers

    def agg(m_in, bg_ref, wnext_ref):
        hh = jnp.dot(a, m_in, preferred_element_type=jnp.float32)   # f32 accum
        hh = jnp.maximum(hh + bg_ref[...], 0.0)
        return jnp.dot(hh, wnext_ref[...], preferred_element_type=jnp.float32)

    m = agg(m, bg1_ref, wg2_ref).astype(jnp.bfloat16)   # conv1 agg + conv2 transform
    m = agg(m, bg2_ref, wg3_ref).astype(jnp.bfloat16)   # conv2 agg + conv3 transform
    out = agg(m, bg3_ref, w2_ref) + b2_ref[...]         # conv3 agg + fc2 (padded)
    out_ref[...] = out.astype(out_ref.dtype)


# ----------------------------------------------------------------------------
# Pallas-call wrappers
# ----------------------------------------------------------------------------
def _run_prologue(x_pad, w1, b1, wg1, tile_row, row_sem):
    n_pad, f = x_pad.shape
    return pl.pallas_call(
        prologue_kernel,
        out_shape=jax.ShapeDtypeStruct((n_pad, HIDDEN), jnp.bfloat16),
        grid_spec=pltpu.PrefetchScalarGridSpec(
            num_scalar_prefetch=0,
            grid=(n_pad // tile_row,),
            in_specs=[
                pl.BlockSpec((tile_row, f), lambda i: (i, 0)),
                pl.BlockSpec((f, HIDDEN), lambda i: (0, 0)),
                pl.BlockSpec((1, HIDDEN), lambda i: (0, 0)),
                pl.BlockSpec((HIDDEN, HIDDEN), lambda i: (0, 0)),
            ],
            out_specs=pl.BlockSpec((tile_row, HIDDEN), lambda i: (i, 0)),
        ),
        compiler_params=pltpu.CompilerParams(dimension_semantics=(row_sem,)),
    )(x_pad, w1, b1, wg1)


def _run_gcn_agg_stream(a_hat, m, bg, w_next, b_next, tile_row, tile_k, row_sem):
    n_pad = a_hat.shape[0]
    next_dim = w_next.shape[1]
    # Double-buffered A blocks + resident M + headroom; set explicitly because
    # v5e's default scoped VMEM (16 MiB) is too small once the tile grows.
    vmem_limit = 2 * (2 * tile_row * tile_k) + 2 * (2 * n_pad * HIDDEN) + (8 << 20)
    vmem_limit = int(min(max(vmem_limit, 32 << 20), _VMEM_LIMIT_CAP))
    return pl.pallas_call(
        gcn_agg_stream_kernel,
        out_shape=jax.ShapeDtypeStruct((n_pad, next_dim), jnp.bfloat16),
        grid_spec=pltpu.PrefetchScalarGridSpec(
            num_scalar_prefetch=0,
            grid=(n_pad // tile_row, n_pad // tile_k),      # reduction axis last
            in_specs=[
                pl.BlockSpec((tile_row, tile_k), lambda i, k: (i, k)),   # A stream
                pl.BlockSpec((n_pad, HIDDEN), lambda i, k: (0, 0)),      # M resident
                pl.BlockSpec((1, HIDDEN), lambda i, k: (0, 0)),          # bg
                pl.BlockSpec((HIDDEN, next_dim), lambda i, k: (0, 0)),   # W_next
                pl.BlockSpec((1, next_dim), lambda i, k: (0, 0)),        # b_next
            ],
            out_specs=pl.BlockSpec((tile_row, next_dim), lambda i, k: (i, 0)),
            scratch_shapes=[pltpu.VMEM((tile_row, HIDDEN), jnp.float32)],
        ),
        compiler_params=pltpu.CompilerParams(
            dimension_semantics=(row_sem, pltpu.ARBITRARY),
            vmem_limit_bytes=vmem_limit),
    )(a_hat, m, bg, w_next, b_next)


def _run_fused(a_hat, x_pad, w1, b1, wg1, bg1, wg2, bg2, wg3, bg3, w2p, b2p):
    n_pad, f = x_pad.shape
    a_bytes = n_pad * n_pad * 2
    vmem_limit = int(min(max(2 * a_bytes + (12 << 20), 32 << 20), _VMEM_LIMIT_CAP))

    def full(shape):
        return pl.BlockSpec(shape, lambda i, s=shape: (0,) * len(s))

    return pl.pallas_call(
        fused_net_kernel,
        out_shape=jax.ShapeDtypeStruct((n_pad, OUT_PAD), jnp.bfloat16),
        grid_spec=pltpu.PrefetchScalarGridSpec(
            num_scalar_prefetch=0,
            grid=(1,),
            in_specs=[
                pl.BlockSpec(memory_space=pl.ANY),     # A_hat stays in HBM; one DMA
                full((n_pad, f)),
                full((f, HIDDEN)), full((1, HIDDEN)),
                full((HIDDEN, HIDDEN)), full((1, HIDDEN)),
                full((HIDDEN, HIDDEN)), full((1, HIDDEN)),
                full((HIDDEN, HIDDEN)), full((1, HIDDEN)),
                full((HIDDEN, OUT_PAD)), full((1, OUT_PAD)),
            ],
            out_specs=full((n_pad, OUT_PAD)),
            scratch_shapes=[pltpu.VMEM((n_pad, n_pad), jnp.bfloat16),
                            pltpu.SemaphoreType.DMA(())],
        ),
        compiler_params=pltpu.CompilerParams(vmem_limit_bytes=vmem_limit),
    )(a_hat, x_pad, w1, b1, wg1, bg1, wg2, bg2, wg3, bg3, w2p, b2p)


# ----------------------------------------------------------------------------
# Graph preparation (hoisted out of the forward pass; cache and reuse)
# ----------------------------------------------------------------------------
def _gcn_norm_entries(edge_index, num_nodes):
    """Edge list + self-loops with D^-1/2 (A+I) D^-1/2 weights (gcn_norm)."""
    row, col = edge_index[0], edge_index[1]                # source, target
    self_loops = jnp.arange(num_nodes, dtype=edge_index.dtype)
    row = jnp.concatenate([row, self_loops])
    col = jnp.concatenate([col, self_loops])
    ew = jnp.ones(row.shape[0], jnp.float32)
    deg = jnp.zeros((num_nodes,), jnp.float32).at[col].add(ew)
    dinv = jnp.where(deg > 0, 1.0 / jnp.sqrt(deg), 0.0)
    return row, col, dinv[row] * ew * dinv[col]


def prepare_adjacency(edge_index, num_nodes, n_pad):
    """Padded, normalized dense adjacency, scattered directly into bf16.

    Build this ONCE per graph and reuse it across forward passes — it is the
    only O(N^2) host-side prep and costs as much HBM traffic as a full
    aggregation layer if rebuilt every call.
    """
    row, col, norm = _gcn_norm_entries(edge_index, num_nodes)
    # out[i] = sum over edges (j -> i): A_hat[i, j] += norm
    return (jnp.zeros((n_pad, n_pad), jnp.bfloat16)
            .at[col, row].add(norm.astype(jnp.bfloat16)))


def choose_layout(num_nodes, *, force_streamed=False):
    """Pick padded size + whether the A-resident fused path applies."""
    n_pad = _round_up(num_nodes, FUSED_ALIGN)
    if not force_streamed and n_pad <= FUSED_MAX_N_PAD:
        return n_pad, True
    return _round_up(num_nodes, TILE_ROW), False


# ----------------------------------------------------------------------------
# Forward pass
# ----------------------------------------------------------------------------
def init_params(key):
    """Deterministic synthetic params, PyTorch shapes: Linear W is (out, in)."""
    ks = jax.random.split(key, 10)

    def lin(kw, kb, out_dim, in_dim):
        bound = 1.0 / jnp.sqrt(in_dim)
        w = jax.random.uniform(kw, (out_dim, in_dim), jnp.float32, -bound, bound)
        b = jax.random.uniform(kb, (out_dim,), jnp.float32, -bound, bound)
        return w, b

    p = {}
    p["fc1_w"], p["fc1_b"] = lin(ks[0], ks[1], HIDDEN, FEATURES)
    p["g1_w"], p["g1_b"] = lin(ks[2], ks[3], HIDDEN, HIDDEN)
    p["g2_w"], p["g2_b"] = lin(ks[4], ks[5], HIDDEN, HIDDEN)
    p["g3_w"], p["g3_b"] = lin(ks[6], ks[7], HIDDEN, HIDDEN)
    p["fc2_w"], p["fc2_b"] = lin(ks[8], ks[9], OUT, HIDDEN)
    return p


def net_forward(x, a_hat, params, *, fused, max_tile_k=None,
                row_sem=pltpu.PARALLEL):
    """Returns the padded (n_pad, OUT_PAD) bf16 logits; slice [:n, :OUT] outside.

    Padded tail rows contain garbage (relu(bias) chains) but can never leak
    into real rows because A_hat[real, pad] == 0; never read rows >= n.
    """
    n_pad = a_hat.shape[0]
    x_pad = jnp.pad(x.astype(jnp.float32), ((0, n_pad - x.shape[0]), (0, 0)))

    # Pre-transpose weights to (in, out); biases to (1, out). fc2 padded to a
    # lane-dense 128-wide slab (zero columns contribute nothing).
    w1 = params["fc1_w"].T
    b1 = params["fc1_b"][None, :]
    wg = [params[f"g{i}_w"].T for i in (1, 2, 3)]
    bg = [params[f"g{i}_b"][None, :] for i in (1, 2, 3)]
    w2p = jnp.zeros((HIDDEN, OUT_PAD), jnp.float32).at[:, :OUT].set(params["fc2_w"].T)
    b2p = jnp.zeros((1, OUT_PAD), jnp.float32).at[:, :OUT].set(params["fc2_b"][None, :])
    zero_b = jnp.zeros((1, HIDDEN), jnp.float32)

    if fused:
        # One kernel, one A_hat HBM read, all three layers + fc1/fc2 inside.
        return _run_fused(a_hat, x_pad, w1, b1, wg[0], bg[0], wg[1], bg[1],
                          wg[2], bg[2], w2p, b2p)

    tile_k = _pick_tile_k(n_pad, _MAX_TILE_K if max_tile_k is None else max_tile_k)
    m = _run_prologue(x_pad, w1, b1, wg[0], TILE_ROW, row_sem)
    m = _run_gcn_agg_stream(a_hat, m, bg[0], wg[1], zero_b, TILE_ROW, tile_k, row_sem)
    m = _run_gcn_agg_stream(a_hat, m, bg[1], wg[2], zero_b, TILE_ROW, tile_k, row_sem)
    return _run_gcn_agg_stream(a_hat, m, bg[2], w2p, b2p, TILE_ROW, tile_k, row_sem)


_jit_forward = jax.jit(net_forward,
                       static_argnames=("fused", "max_tile_k", "row_sem"))


def run_forward(x, a_hat, params, *, fused, max_tile_k=None):
    """On v7x, try CORE_PARALLEL on the row axis so row blocks shard across both
    TensorCores; fall back to PARALLEL (measured-neutral on single-TC v5e/v6e)
    if the toolchain rejects it."""
    sems = ([pltpu.CORE_PARALLEL, pltpu.PARALLEL]
            if (_IS_MULTI_TC and not fused) else [pltpu.PARALLEL])
    err = None
    for sem in sems:
        try:
            return jax.block_until_ready(
                _jit_forward(x, a_hat, params, fused=fused,
                             max_tile_k=max_tile_k, row_sem=sem))
        except Exception as e:  # only hit if CORE_PARALLEL is rejected
            err = e
    raise err


# ----------------------------------------------------------------------------
# Pure-JAX f32 reference (reproduces the PyTorch module semantics)
# ----------------------------------------------------------------------------
def reference_forward(x, edge_index, params):
    n = x.shape[0]
    row, col, norm = _gcn_norm_entries(edge_index, n)
    a = jnp.zeros((n, n), jnp.float32).at[col, row].add(norm)
    h = jax.nn.relu(x @ params["fc1_w"].T + params["fc1_b"])
    for name in ("g1", "g2", "g3"):
        h = jax.nn.relu(a @ (h @ params[name + "_w"].T) + params[name + "_b"])
    return h @ params["fc2_w"].T + params["fc2_b"]


if __name__ == "__main__":
    key = jax.random.PRNGKey(0)
    k_x1, k_e1, k_p, k_x2, k_e2 = jax.random.split(key, 5)
    params = init_params(k_p)

    # --- small graph: A-resident single-kernel fused path ------------------
    n1, e1 = 16, 32
    x1 = jax.random.normal(k_x1, (n1, FEATURES), jnp.float32)
    ei1 = jax.random.randint(k_e1, (2, e1), 0, n1, jnp.int32)
    n_pad1, fused1 = choose_layout(n1)
    a1 = prepare_adjacency(ei1, n1, n_pad1)            # built once, reusable
    out1 = run_forward(x1, a1, params, fused=fused1)
    out1 = jnp.asarray(out1)[:n1, :OUT].astype(jnp.float32)
    ref1 = reference_forward(x1, ei1, params)
    assert out1.shape == (n1, OUT)
    err1 = float(jnp.max(jnp.abs(out1 - ref1)))
    assert jnp.allclose(out1, ref1, atol=3e-2, rtol=3e-2), err1

    # --- larger graph: exercise the streamed (tiled A_hat) path too ---------
    n2, e2 = 700, 2800
    x2 = jax.random.normal(k_x2, (n2, FEATURES), jnp.float32)
    ei2 = jax.random.randint(k_e2, (2, e2), 0, n2, jnp.int32)
    n_pad2, _ = choose_layout(n2, force_streamed=True)
    a2 = prepare_adjacency(ei2, n2, n_pad2)
    # small tile_k so the (row, k) grid and f32 accumulator path are exercised
    out2 = run_forward(x2, a2, params, fused=False, max_tile_k=512)
    out2 = jnp.asarray(out2)[:n2, :OUT].astype(jnp.float32)
    ref2 = reference_forward(x2, ei2, params)
    err2 = float(jnp.max(jnp.abs(out2 - ref2)))
    assert jnp.allclose(out2, ref2, atol=3e-2, rtol=3e-2), err2

    print("KERNEL_OK")
</pallas_src>

<mosaic_0001>
module attributes {stable_mosaic.version = 11 : i64} {
  func.func @fused_net_kernel(%arg0: i32, %arg1: memref<256x256xbf16, #tpu.memory_space<any>>, %arg2: memref<256x4xf32, #tpu.memory_space<vmem>>, %arg3: memref<4x32xf32, #tpu.memory_space<vmem>>, %arg4: memref<1x32xf32, #tpu.memory_space<vmem>>, %arg5: memref<32x32xf32, #tpu.memory_space<vmem>>, %arg6: memref<1x32xf32, #tpu.memory_space<vmem>>, %arg7: memref<32x32xf32, #tpu.memory_space<vmem>>, %arg8: memref<1x32xf32, #tpu.memory_space<vmem>>, %arg9: memref<32x32xf32, #tpu.memory_space<vmem>>, %arg10: memref<1x32xf32, #tpu.memory_space<vmem>>, %arg11: memref<32x128xf32, #tpu.memory_space<vmem>>, %arg12: memref<1x128xf32, #tpu.memory_space<vmem>>, %arg13: memref<256x128xbf16, #tpu.memory_space<vmem>>, %arg14: memref<256x256xbf16, #tpu.memory_space<vmem>>, %arg15: memref<!tpu.dma_semaphore, #tpu.memory_space<semaphore_mem>>) attributes {dimension_semantics = [#tpu.dimension_semantics<arbitrary>], iteration_bounds = array<i64: 1>, scalar_prefetch = 0 : i64, scratch_operands = 2 : i64, tpu.core_type = #tpu.core_type<tc>, window_params = [{}, {pipeline_mode = #tpu.pipeline_mode<synchronous>, transform_indices = @transform_1, window_bounds = array<i64: 256, 4>}, {pipeline_mode = #tpu.pipeline_mode<synchronous>, transform_indices = @transform_2, window_bounds = array<i64: 4, 32>}, {pipeline_mode = #tpu.pipeline_mode<synchronous>, transform_indices = @transform_3, window_bounds = array<i64: 1, 32>}, {pipeline_mode = #tpu.pipeline_mode<synchronous>, transform_indices = @transform_4, window_bounds = array<i64: 32, 32>}, {pipeline_mode = #tpu.pipeline_mode<synchronous>, transform_indices = @transform_5, window_bounds = array<i64: 1, 32>}, {pipeline_mode = #tpu.pipeline_mode<synchronous>, transform_indices = @transform_6, window_bounds = array<i64: 32, 32>}, {pipeline_mode = #tpu.pipeline_mode<synchronous>, transform_indices = @transform_7, window_bounds = array<i64: 1, 32>}, {pipeline_mode = #tpu.pipeline_mode<synchronous>, transform_indices = @transform_8, window_bounds = array<i64: 32, 32>}, {pipeline_mode = #tpu.pipeline_mode<synchronous>, transform_indices = @transform_9, window_bounds = array<i64: 1, 32>}, {pipeline_mode = #tpu.pipeline_mode<synchronous>, transform_indices = @transform_10, window_bounds = array<i64: 32, 128>}, {pipeline_mode = #tpu.pipeline_mode<synchronous>, transform_indices = @transform_11, window_bounds = array<i64: 1, 128>}, {pipeline_mode = #tpu.pipeline_mode<synchronous>, transform_indices = @transform_12, window_bounds = array<i64: 256, 128>}]} {
    tpu.enqueue_dma source(%arg1 : memref<256x256xbf16, #tpu.memory_space<any>>) target(%arg14 : memref<256x256xbf16, #tpu.memory_space<vmem>>) target_semaphore(%arg15 : memref<!tpu.dma_semaphore, #tpu.memory_space<semaphore_mem>>)
    %c0 = arith.constant 0 : index
    %c0_0 = arith.constant 0 : index
    %0 = vector.load %arg2[%c0, %c0_0] : memref<256x4xf32, #tpu.memory_space<vmem>>, vector<256x4xf32>
    %c0_1 = arith.constant 0 : index
    %c0_2 = arith.constant 0 : index
    %1 = vector.load %arg3[%c0_1, %c0_2] : memref<4x32xf32, #tpu.memory_space<vmem>>, vector<4x32xf32>
    %cst = arith.constant dense<0.000000e+00> : vector<256x32xf32>
    %2 = tpu.matmul %0, %1, %cst {dimension_numbers = #tpu.dot_dimension_numbers<[1], [0], [0], [1], [0, 0, 1, 1], [], []>} : vector<256x4xf32>, vector<4x32xf32>, vector<256x32xf32> -> vector<256x32xf32>
    %c0_3 = arith.constant 0 : index
    %c0_4 = arith.constant 0 : index
    %3 = vector.load %arg4[%c0_3, %c0_4] : memref<1x32xf32, #tpu.memory_space<vmem>>, vector<1x32xf32>
    %4 = vector.broadcast %3 : vector<1x32xf32> to vector<256x32xf32>
    %5 = arith.addf %2, %4 : vector<256x32xf32>
    %cst_5 = arith.constant 0.000000e+00 : f32
    %6 = vector.broadcast %cst_5 : f32 to vector<256x32xf32>
    %7 = arith.maximumf %5, %6 : vector<256x32xf32>
    %c0_6 = arith.constant 0 : index
    %c0_7 = arith.constant 0 : index
    %8 = vector.load %arg5[%c0_6, %c0_7] : memref<32x32xf32, #tpu.memory_space<vmem>>, vector<32x32xf32>
    %cst_8 = arith.constant dense<0.000000e+00> : vector<256x32xf32>
    %9 = tpu.matmul %7, %8, %cst_8 {dimension_numbers = #tpu.dot_dimension_numbers<[1], [0], [0], [1], [0, 0, 1, 1], [], []>} : vector<256x32xf32>, vector<32x32xf32>, vector<256x32xf32> -> vector<256x32xf32>
    %10 = arith.truncf %9 : vector<256x32xf32> to vector<256x32xbf16>
    tpu.wait_dma2 semaphore(%arg15 : memref<!tpu.dma_semaphore, #tpu.memory_space<semaphore_mem>>) src(%arg1 : memref<256x256xbf16, #tpu.memory_space<any>>) dst(%arg14 : memref<256x256xbf16, #tpu.memory_space<vmem>>)
    %c0_9 = arith.constant 0 : index
    %c0_10 = arith.constant 0 : index
    %11 = vector.load %arg14[%c0_9, %c0_10] : memref<256x256xbf16, #tpu.memory_space<vmem>>, vector<256x256xbf16>
    %cst_11 = arith.constant dense<0.000000e+00> : vector<256x32xf32>
    %12 = tpu.matmul %11, %10, %cst_11 {dimension_numbers = #tpu.dot_dimension_numbers<[1], [0], [0], [1], [0, 0, 1, 1], [], []>} : vector<256x256xbf16>, vector<256x32xbf16>, vector<256x32xf32> -> vector<256x32xf32>
    %c0_12 = arith.constant 0 : index
    %c0_13 = arith.constant 0 : index
    %13 = vector.load %arg6[%c0_12, %c0_13] : memref<1x32xf32, #tpu.memory_space<vmem>>, vector<1x32xf32>
    %14 = vector.broadcast %13 : vector<1x32xf32> to vector<256x32xf32>
    %15 = arith.addf %12, %14 : vector<256x32xf32>
    %cst_14 = arith.constant 0.000000e+00 : f32
    %16 = vector.broadcast %cst_14 : f32 to vector<256x32xf32>
    %17 = arith.maximumf %15, %16 : vector<256x32xf32>
    %c0_15 = arith.constant 0 : index
    %c0_16 = arith.constant 0 : index
    %18 = vector.load %arg7[%c0_15, %c0_16] : memref<32x32xf32, #tpu.memory_space<vmem>>, vector<32x32xf32>
    %cst_17 = arith.constant dense<0.000000e+00> : vector<256x32xf32>
    %19 = tpu.matmul %17, %18, %cst_17 {dimension_numbers = #tpu.dot_dimension_numbers<[1], [0], [0], [1], [0, 0, 1, 1], [], []>} : vector<256x32xf32>, vector<32x32xf32>, vector<256x32xf32> -> vector<256x32xf32>
    %20 = arith.truncf %19 : vector<256x32xf32> to vector<256x32xbf16>
    %cst_18 = arith.constant dense<0.000000e+00> : vector<256x32xf32>
    %21 = tpu.matmul %11, %20, %cst_18 {dimension_numbers = #tpu.dot_dimension_numbers<[1], [0], [0], [1], [0, 0, 1, 1], [], []>} : vector<256x256xbf16>, vector<256x32xbf16>, vector<256x32xf32> -> vector<256x32xf32>
    %c0_19 = arith.constant 0 : index
    %c0_20 = arith.constant 0 : index
    %22 = vector.load %arg8[%c0_19, %c0_20] : memref<1x32xf32, #tpu.memory_space<vmem>>, vector<1x32xf32>
    %23 = vector.broadcast %22 : vector<1x32xf32> to vector<256x32xf32>
    %24 = arith.addf %21, %23 : vector<256x32xf32>
    %cst_21 = arith.constant 0.000000e+00 : f32
    %25 = vector.broadcast %cst_21 : f32 to vector<256x32xf32>
    %26 = arith.maximumf %24, %25 : vector<256x32xf32>
    %c0_22 = arith.constant 0 : index
    %c0_23 = arith.constant 0 : index
    %27 = vector.load %arg9[%c0_22, %c0_23] : memref<32x32xf32, #tpu.memory_space<vmem>>, vector<32x32xf32>
    %cst_24 = arith.constant dense<0.000000e+00> : vector<256x32xf32>
    %28 = tpu.matmul %26, %27, %cst_24 {dimension_numbers = #tpu.dot_dimension_numbers<[1], [0], [0], [1], [0, 0, 1, 1], [], []>} : vector<256x32xf32>, vector<32x32xf32>, vector<256x32xf32> -> vector<256x32xf32>
    %29 = arith.truncf %28 : vector<256x32xf32> to vector<256x32xbf16>
    %cst_25 = arith.constant dense<0.000000e+00> : vector<256x32xf32>
    %30 = tpu.matmul %11, %29, %cst_25 {dimension_numbers = #tpu.dot_dimension_numbers<[1], [0], [0], [1], [0, 0, 1, 1], [], []>} : vector<256x256xbf16>, vector<256x32xbf16>, vector<256x32xf32> -> vector<256x32xf32>
    %c0_26 = arith.constant 0 : index
    %c0_27 = arith.constant 0 : index
    %31 = vector.load %arg10[%c0_26, %c0_27] : memref<1x32xf32, #tpu.memory_space<vmem>>, vector<1x32xf32>
    %32 = vector.broadcast %31 : vector<1x32xf32> to vector<256x32xf32>
    %33 = arith.addf %30, %32 : vector<256x32xf32>
    %cst_28 = arith.constant 0.000000e+00 : f32
    %34 = vector.broadcast %cst_28 : f32 to vector<256x32xf32>
    %35 = arith.maximumf %33, %34 : vector<256x32xf32>
    %c0_29 = arith.constant 0 : index
    %c0_30 = arith.constant 0 : index
    %36 = vector.load %arg11[%c0_29, %c0_30] : memref<32x128xf32, #tpu.memory_space<vmem>>, vector<32x128xf32>
    %cst_31 = arith.constant dense<0.000000e+00> : vector<256x128xf32>
    %37 = tpu.matmul %35, %36, %cst_31 {dimension_numbers = #tpu.dot_dimension_numbers<[1], [0], [0], [1], [0, 0, 1, 1], [], []>} : vector<256x32xf32>, vector<32x128xf32>, vector<256x128xf32> -> vector<256x128xf32>
    %c0_32 = arith.constant 0 : index
    %c0_33 = arith.constant 0 : index
    %38 = vector.load %arg12[%c0_32, %c0_33] : memref<1x128xf32, #tpu.memory_space<vmem>>, vector<1x128xf32>
    %39 = vector.broadcast %38 : vector<1x128xf32> to vector<256x128xf32>
    %40 = arith.addf %37, %39 : vector<256x128xf32>
    %41 = arith.truncf %40 : vector<256x128xf32> to vector<256x128xbf16>
    %c0_34 = arith.constant 0 : index
    %c0_35 = arith.constant 0 : index
    %42 = vector.load %arg13[%c0_34, %c0_35] : memref<256x128xbf16, #tpu.memory_space<vmem>>, vector<256x128xbf16>
    tpu.vector_store %arg13[%c0_34, %c0_35], %41 {strides = array<i32>} : memref<256x128xbf16, #tpu.memory_space<vmem>>, vector<256x128xbf16>,
    return
  }
  func.func @transform_1(%arg0: i32) -> (i32, i32) {
    %c0_i32 = arith.constant 0 : i32
    %c0_i32_0 = arith.constant 0 : i32
    %c0_i32_1 = arith.constant 0 : i32
    return %c0_i32, %c0_i32_0 : i32, i32
  }
  func.func @transform_2(%arg0: i32) -> (i32, i32) {
    %c0_i32 = arith.constant 0 : i32
    %c0_i32_0 = arith.constant 0 : i32
    %c0_i32_1 = arith.constant 0 : i32
    return %c0_i32, %c0_i32_0 : i32, i32
  }
  func.func @transform_3(%arg0: i32) -> (i32, i32) {
    %c0_i32 = arith.constant 0 : i32
    %c0_i32_0 = arith.constant 0 : i32
    %c0_i32_1 = arith.constant 0 : i32
    return %c0_i32, %c0_i32_0 : i32, i32
  }
  func.func @transform_4(%arg0: i32) -> (i32, i32) {
    %c0_i32 = arith.constant 0 : i32
    %c0_i32_0 = arith.constant 0 : i32
    %c0_i32_1 = arith.constant 0 : i32
    return %c0_i32, %c0_i32_0 : i32, i32
  }
  func.func @transform_5(%arg0: i32) -> (i32, i32) {
    %c0_i32 = arith.constant 0 : i32
    %c0_i32_0 = arith.constant 0 : i32
    %c0_i32_1 = arith.constant 0 : i32
    return %c0_i32, %c0_i32_0 : i32, i32
  }
  func.func @transform_6(%arg0: i32) -> (i32, i32) {
    %c0_i32 = arith.constant 0 : i32
    %c0_i32_0 = arith.constant 0 : i32
    %c0_i32_1 = arith.constant 0 : i32
    return %c0_i32, %c0_i32_0 : i32, i32
  }
  func.func @transform_7(%arg0: i32) -> (i32, i32) {
    %c0_i32 = arith.constant 0 : i32
    %c0_i32_0 = arith.constant 0 : i32
    %c0_i32_1 = arith.constant 0 : i32
    return %c0_i32, %c0_i32_0 : i32, i32
  }
  func.func @transform_8(%arg0: i32) -> (i32, i32) {
    %c0_i32 = arith.constant 0 : i32
    %c0_i32_0 = arith.constant 0 : i32
    %c0_i32_1 = arith.constant 0 : i32
    return %c0_i32, %c0_i32_0 : i32, i32
  }
  func.func @transform_9(%arg0: i32) -> (i32, i32) {
    %c0_i32 = arith.constant 0 : i32
    %c0_i32_0 = arith.constant 0 : i32
    %c0_i32_1 = arith.constant 0 : i32
    return %c0_i32, %c0_i32_0 : i32, i32
  }
  func.func @transform_10(%arg0: i32) -> (i32, i32) {
    %c0_i32 = arith.constant 0 : i32
    %c0_i32_0 = arith.constant 0 : i32
    %c0_i32_1 = arith.constant 0 : i32
    return %c0_i32, %c0_i32_0 : i32, i32
  }
  func.func @transform_11(%arg0: i32) -> (i32, i32) {
    %c0_i32 = arith.constant 0 : i32
    %c0_i32_0 = arith.constant 0 : i32
    %c0_i32_1 = arith.constant 0 : i32
    return %c0_i32, %c0_i32_0 : i32, i32
  }
  func.func @transform_12(%arg0: i32) -> (i32, i32) {
    %c0_i32 = arith.constant 0 : i32
    %c0_i32_0 = arith.constant 0 : i32
    %c0_i32_1 = arith.constant 0 : i32
    return %c0_i32, %c0_i32_0 : i32, i32
  }
}

</mosaic_0001>

<bundles_post_ra>
// kernel: net_forward.1
= control target key start
LH: loop header
LB: loop body
LE: loop exit
PB: predicated region body
PF: predicated region fallthrough
CT: control target
= control target key end

     0   :  { %17 = vsyncpa [#allocation5], 0  ;;  %s3621_s0 = inlined_call_operand.vmem [shape: bf16[256,256], index: 0, kind: input, shape index: {}]   ;;  %s3622_s1 = inlined_call_operand.vmem [shape: f32[256,4], index: 1, kind: input, shape index: {}]   ;;  %s3623_s2 = inlined_call_operand.vmem [shape: f32[4,32], index: 2, kind: input, shape index: {}]   ;;  %s3624_s3 = inlined_call_operand.vmem [shape: f32[1,32], index: 3, kind: input, shape index: {}]   ;;  %s3625_s4 = inlined_call_operand.vmem [shape: f32[32,32], index: 4, kind: input, shape index: {}]   ;;  %s3626_s5 = inlined_call_operand.vmem [shape: f32[1,32], index: 5, kind: input, shape index: {}]   ;;  %s3627_s6 = inlined_call_operand.vmem [shape: f32[32,32], index: 6, kind: input, shape index: {}]   ;;  %s3628_s7 = inlined_call_operand.vmem [shape: f32[1,32], index: 7, kind: input, shape index: {}]   ;;  %s3629_s8 = inlined_call_operand.vmem [shape: f32[32,32], index: 8, kind: input, shape index: {}]   ;;  %s3630_s9 = inlined_call_operand.vmem [shape: f32[1,32], index: 9, kind: input, shape index: {}]   ;;  %s3631_s10 = inlined_call_operand.vmem [shape: f32[32,128], index: 10, kind: input, shape index: {}]   ;;  %s3632_s11 = inlined_call_operand.vmem [shape: f32[1,128], index: 11, kind: input, shape index: {}]   ;;  %s3633_s12 = inlined_call_operand.hbm [shape: bf16[256,128], index: 12, kind: output, shape index: {}]  }
   0x1   :  { %v50_v0 = vld [vmem:[%s3621_s0] sm:$0xff]  ;;  %v52_v1 = vld [vmem:[%s3621_s0 + $0x8] sm:$0xff]  ;;  %v54_v2 = vld [vmem:[%s3621_s0 + $0x10] sm:$0xff] }
   0x2   :  { %51 = vst [vmem:[#allocation2] sm:$0xff] %v50_v0  ;;  %v56_v3 = vld [vmem:[%s3621_s0 + $0x18] sm:$0xff]  ;;  %v58_v4 = vld [vmem:[%s3621_s0 + $0x20] sm:$0xff]  ;;  %v60_v5 = vld [vmem:[%s3621_s0 + $0x28] sm:$0xff] }
   0x3   :  { %53 = vst [vmem:[#allocation2 + $0x8] sm:$0xff] %v52_v1  ;;  %v62_v6 = vld [vmem:[%s3621_s0 + $0x30] sm:$0xff]  ;;  %v64_v7 = vld [vmem:[%s3621_s0 + $0x38] sm:$0xff]  ;;  %v66_v8 = vld [vmem:[%s3621_s0 + $0x40] sm:$0xff] }
   0x4   :  { %55 = vst [vmem:[#allocation2 + $0x10] sm:$0xff] %v54_v2  ;;  %v68_v9 = vld [vmem:[%s3621_s0 + $0x48] sm:$0xff]  ;;  %v70_v10 = vld [vmem:[%s3621_s0 + $0x50] sm:$0xff]  ;;  %v72_v11 = vld [vmem:[%s3621_s0 + $0x58] sm:$0xff] }
   0x5   :  { %57 = vst [vmem:[#allocation2 + $0x18] sm:$0xff] %v56_v3  ;;  %v74_v12 = vld [vmem:[%s3621_s0 + $0x60] sm:$0xff]  ;;  %v76_v13 = vld [vmem:[%s3621_s0 + $0x68] sm:$0xff]  ;;  %v78_v14 = vld [vmem:[%s3621_s0 + $0x70] sm:$0xff] }
   0x6   :  { %59 = vst [vmem:[#allocation2 + $0x20] sm:$0xff] %v58_v4  ;;  %v80_v15 = vld [vmem:[%s3621_s0 + $0x78] sm:$0xff]  ;;  %v82_v16 = vld [vmem:[%s3621_s0 + $0x80] sm:$0xff]  ;;  %v84_v17 = vld [vmem:[%s3621_s0 + $0x88] sm:$0xff] }
   0x7   :  { %61 = vst [vmem:[#allocation2 + $0x28] sm:$0xff] %v60_v5  ;;  %v86_v18 = vld [vmem:[%s3621_s0 + $0x90] sm:$0xff]  ;;  %v88_v19 = vld [vmem:[%s3621_s0 + $0x98] sm:$0xff]  ;;  %v90_v20 = vld [vmem:[%s3621_s0 + $0xa0] sm:$0xff] }
   0x8   :  { %63 = vst [vmem:[#allocation2 + $0x30] sm:$0xff] %v62_v6  ;;  %v92_v21 = vld [vmem:[%s3621_s0 + $0xa8] sm:$0xff]  ;;  %v94_v22 = vld [vmem:[%s3621_s0 + $0xb0] sm:$0xff]  ;;  %v96_v23 = vld [vmem:[%s3621_s0 + $0xb8] sm:$0xff] }
   0x9   :  { %65 = vst [vmem:[#allocation2 + $0x38] sm:$0xff] %v64_v7  ;;  %v98_v24 = vld [vmem:[%s3621_s0 + $0xc0] sm:$0xff]  ;;  %v100_v25 = vld [vmem:[%s3621_s0 + $0xc8] sm:$0xff]  ;;  %v102_v26 = vld [vmem:[%s3621_s0 + $0xd0] sm:$0xff] }
   0xa   :  { %67 = vst [vmem:[#allocation2 + $0x40] sm:$0xff] %v66_v8  ;;  %v104_v27 = vld [vmem:[%s3621_s0 + $0xd8] sm:$0xff]  ;;  %v106_v28 = vld [vmem:[%s3621_s0 + $0xe0] sm:$0xff]  ;;  %v108_v29 = vld [vmem:[%s3621_s0 + $0xe8] sm:$0xff] }
   0xb   :  { %69 = vst [vmem:[#allocation2 + $0x48] sm:$0xff] %v68_v9  ;;  %v110_v30 = vld [vmem:[%s3621_s0 + $0xf0] sm:$0xff]  ;;  %v112_v31 = vld [vmem:[%s3621_s0 + $0xf8] sm:$0xff] }
   0xc   :  { %71 = vst [vmem:[#allocation2 + $0x50] sm:$0xff] %v70_v10 }
   0xd   :  { %73 = vst [vmem:[#allocation2 + $0x58] sm:$0xff] %v72_v11 }
   0xe   :  { %75 = vst [vmem:[#allocation2 + $0x60] sm:$0xff] %v74_v12 }
   0xf   :  { %77 = vst [vmem:[#allocation2 + $0x68] sm:$0xff] %v76_v13 }
  0x10   :  { %79 = vst [vmem:[#allocation2 + $0x70] sm:$0xff] %v78_v14 }
  0x11   :  { %81 = vst [vmem:[#allocation2 + $0x78] sm:$0xff] %v80_v15 }
  0x12   :  { %83 = vst [vmem:[#allocation2 + $0x80] sm:$0xff] %v82_v16 }
  0x13   :  { %85 = vst [vmem:[#allocation2 + $0x88] sm:$0xff] %v84_v17 }
  0x14   :  { %87 = vst [vmem:[#allocation2 + $0x90] sm:$0xff] %v86_v18 }
  0x15   :  { %89 = vst [vmem:[#allocation2 + $0x98] sm:$0xff] %v88_v19 }
  0x16   :  { %91 = vst [vmem:[#allocation2 + $0xa0] sm:$0xff] %v90_v20 }
  0x17   :  { %93 = vst [vmem:[#allocation2 + $0xa8] sm:$0xff] %v92_v21 }
  0x18   :  { %95 = vst [vmem:[#allocation2 + $0xb0] sm:$0xff] %v94_v22 }
  0x19   :  { %97 = vst [vmem:[#allocation2 + $0xb8] sm:$0xff] %v96_v23 }
  0x1a   :  { %99 = vst [vmem:[#allocation2 + $0xc0] sm:$0xff] %v98_v24 }
  0x1b   :  { %101 = vst [vmem:[#allocation2 + $0xc8] sm:$0xff] %v100_v25 }
  0x1c   :  { %103 = vst [vmem:[#allocation2 + $0xd0] sm:$0xff] %v102_v26 }
  0x1d   :  { %105 = vst [vmem:[#allocation2 + $0xd8] sm:$0xff] %v104_v27 }
  0x1e   :  { %107 = vst [vmem:[#allocation2 + $0xe0] sm:$0xff] %v106_v28 }
  0x1f   :  { %109 = vst [vmem:[#allocation2 + $0xe8] sm:$0xff] %v108_v29 }
  0x20   :  { %111 = vst [vmem:[#allocation2 + $0xf0] sm:$0xff] %v110_v30 }
  0x21   :  { %113 = vst [vmem:[#allocation2 + $0xf8] sm:$0xff] %v112_v31 }
  0x22   :  { %119 = vsyncadd [#allocation3], 4096  ;;  %v152_v32 = vld [vmem:[%s3623_s2] sm:$0xf]  ;;  %vm254_vm0 = vcmask 1043456   ;;  %vm157_vm1 = vcmask 31744  }
  0x23   :  { %v120_v33 = vld [vmem:[%s3622_s1] sm:$0xff]  ;;  %2238 = vmatpush.msk.msra.mxu0 %vm254_vm0, %v152_v32  ;;  %2655 = vmatpush.msk.msra.mxu3 %vm254_vm0, %v152_v32  ;;  %v121_v34 = vld [vmem:[%s3622_s1 + $0x8] sm:$0xff]  ;;  %v122_v35 = vld [vmem:[%s3622_s1 + $0x10] sm:$0xff]  ;;  %vm407_vm2 = vcmask 261120  }
  0x24   :  { %2239 = vmatmul.msk.f32.vlgmr.msra.gmra.mxu0 %vm157_vm1, %v120_v33  ;;  %v123_v36 = vld [vmem:[%s3622_s1 + $0x18] sm:$0xff]  ;;  %v124_v37 = vld [vmem:[%s3622_s1 + $0x20] sm:$0xff]  ;;  %v125_v38 = vld [vmem:[%s3622_s1 + $0x28] sm:$0xff] }
  0x25   :  { %v126_v39 = vld [vmem:[%s3622_s1 + $0x30] sm:$0xff]  ;;  %v127_v40 = vld [vmem:[%s3622_s1 + $0x38] sm:$0xff]  ;;  %v128_v41 = vld [vmem:[%s3622_s1 + $0x40] sm:$0xff] }
  0x26   :  { %v129_v42 = vld [vmem:[%s3622_s1 + $0x48] sm:$0xff]  ;;  %v130_v43 = vld [vmem:[%s3622_s1 + $0x50] sm:$0xff]  ;;  %v131_v44 = vld [vmem:[%s3622_s1 + $0x58] sm:$0xff] }
  0x27   :  { %v406_v45 = vld [vmem:[%s3625_s4 + $0x18] sm:$0xff]  ;;  %v405_v46 = vld [vmem:[%s3625_s4 + $0x10] sm:$0xff]  ;;  %v132_v47 = vld [vmem:[%s3622_s1 + $0x60] sm:$0xff] }
  0x28   :  { %516 = vmatpush.msra.mxu1 %v406_v45  ;;  %2656 = vmatpush.msrb.mxu3 %v406_v45  ;;  %v404_v48 = vld [vmem:[%s3625_s4 + $0x8] sm:$0xff]  ;;  %v403_v49 = vld [vmem:[%s3625_s4] sm:$0xff]  ;;  %v134_v51 = vld [vmem:[%s3622_s1 + $0x70] sm:$0xff] }
  0x29   :  { %v133_v50 = vld [vmem:[%s3622_s1 + $0x68] sm:$0xff]  ;;  %v135_v52 = vld [vmem:[%s3622_s1 + $0x78] sm:$0xff]  ;;  %v2946_v53 = vld [vmem:[%s3624_s3] ss:$0 sm:$0xff] }
  0x2a   :  { %517 = vmatpush.msra.mxu1 %v405_v46  ;;  %2657 = vmatpush.msrb.mxu3 %v405_v46  ;;  %v136_v55 = vld [vmem:[%s3622_s1 + $0x80] sm:$0xff]  ;;  %v137_v59 = vld [vmem:[%s3622_s1 + $0x88] sm:$0xff]  ;;  %v138_v63 = vld [vmem:[%s3622_s1 + $0x90] sm:$0xff] }
  0x2b   :  { %v139_v3 = vld [vmem:[%s3622_s1 + $0x98] sm:$0xff]  ;;  %v140_v7 = vld [vmem:[%s3622_s1 + $0xa0] sm:$0xff]  ;;  %v141_v11 = vld [vmem:[%s3622_s1 + $0xa8] sm:$0xff] }
  0x2c   :  { %2240 = vmatmul.msk.f32.gmra.mxu0 %vm157_vm1, %v121_v34  ;;  %518 = vmatpush.msra.mxu1 %v404_v48  ;;  %v146_v14 = vld [vmem:[%s3622_s1 + $0xd0] sm:$0xff]  ;;  %v147_v19 = vld [vmem:[%s3622_s1 + $0xd8] sm:$0xff]  ;;  %v148_v24 = vld [vmem:[%s3622_s1 + $0xe0] sm:$0xff] }
  0x2d   :  { %2658 = vmatpush.msrb.mxu3 %v404_v48  ;;  %v142_v16 = vld [vmem:[%s3622_s1 + $0xb0] sm:$0xff]  ;;  %v143_v21 = vld [vmem:[%s3622_s1 + $0xb8] sm:$0xff]  ;;  %v144_v26 = vld [vmem:[%s3622_s1 + $0xc0] sm:$0xff] }
  0x2e   :  { %519 = vmatpush.msra.mxu1 %v403_v49  ;;  %2265 = vmatmul.msk.f32.vlgmr.msra.gmra.mxu3 %vm157_vm1, %v146_v14  ;;  %v149_v29 = vld [vmem:[%s3622_s1 + $0xe8] sm:$0xff]  ;;  %v150_v34 = vld [vmem:[%s3622_s1 + $0xf0] sm:$0xff] }
  0x2f   :  { %2659 = vmatpush.msrb.mxu3 %v403_v49  ;;  %v145_v31 = vld [vmem:[%s3622_s1 + $0xc8] sm:$0xff] }
  0x34   :  { %2241 = vmatmul.msk.f32.gmra.mxu0 %vm157_vm1, %v122_v35 }
  0x36   :  { %2266 = vmatmul.msk.f32.gmra.mxu3 %vm157_vm1, %v147_v19 }
  0x3c   :  { %2242 = vmatmul.msk.f32.gmra.mxu0 %vm157_vm1, %v123_v36 }
  0x3e   :  { %2267 = vmatmul.msk.f32.gmra.mxu3 %vm157_vm1, %v148_v24 }
  0x44   :  { %2243 = vmatmul.msk.f32.gmra.mxu0 %vm157_vm1, %v124_v37 }
  0x46   :  { %2268 = vmatmul.msk.f32.gmra.mxu3 %vm157_vm1, %v149_v29 }
  0x4c   :  { %2244 = vmatmul.msk.f32.gmra.mxu0 %vm157_vm1, %v125_v38  ;;  %v151_v38 = vld [vmem:[%s3622_s1 + $0xf8] sm:$0xff] }
  0x4e   :  { %2269 = vmatmul.msk.f32.gmra.mxu3 %vm157_vm1, %v150_v34 }
  0x54   :  { %2245 = vmatmul.msk.f32.gmra.mxu0 %vm157_vm1, %v126_v39 }
  0x56   :  { %2270 = vmatmul.msk.f32.gmra.mxu3 %vm157_vm1, %v151_v38 }
  0x5c   :  { %2246 = vmatmul.msk.f32.gmra.mxu0 %vm157_vm1, %v127_v40 }
  0x64   :  { %2247 = vmatmul.msk.f32.gmra.mxu0 %vm157_vm1, %v128_v41 }
  0x6c   :  { %2248 = vmatmul.msk.f32.gmra.mxu0 %vm157_vm1, %v129_v42 }
  0x74   :  { %2249 = vmatmul.msk.f32.gmra.mxu0 %vm157_vm1, %v130_v43 }
  0x7c   :  { %2250 = vmatmul.msk.f32.gmra.mxu0 %vm157_vm1, %v131_v44 }
  0x84   :  { %2251 = vmatmul.msk.f32.gmra.mxu0 %vm157_vm1, %v132_v47 }
  0x8c   :  { %2252 = vmatmul.msk.f32.gmra.mxu0 %vm157_vm1, %v133_v50 }
  0x94   :  { %2253 = vmatmul.msk.f32.gmra.mxu0 %vm157_vm1, %v134_v51 }
  0x9c   :  { %2254 = vmatmul.msk.f32.gmra.mxu0 %vm157_vm1, %v135_v52 }
  0xa1   :  { %v275_v54 = vpop.f32.mrf.mxu0 }
  0xa2   :  { %v276_v56 = vadd.f32 %v2946_v53, %v275_v54 }
  0xa4   :  { %v371_v57 = vmax.f32 %v276_v56, 0.0  ;;  %2255 = vmatmul.msk.f32.gmra.mxu0 %vm157_vm1, %v136_v55 }
  0xa6   :  { %2271 = vmatmul.msk.f32.vlgmr.msra.gmra.mxu1 %vm407_vm2, %v371_v57 }
  0xa9   :  { %v278_v58 = vpop.f32.mrf.mxu0 }
  0xaa   :  { %v279_v60 = vadd.f32 %v2946_v53, %v278_v58 }
  0xac   :  { %v372_v61 = vmax.f32 %v279_v60, 0.0  ;;  %2256 = vmatmul.msk.f32.gmra.mxu0 %vm157_vm1, %v137_v59 }
  0xae   :  { %2272 = vmatmul.msk.f32.gmra.mxu1 %vm407_vm2, %v372_v61 }
  0xb1   :  { %v281_v62 = vpop.f32.mrf.mxu0 }
  0xb2   :  { %v282_v0 = vadd.f32 %v2946_v53, %v281_v62 }
  0xb4   :  { %v373_v1 = vmax.f32 %v282_v0, 0.0  ;;  %2257 = vmatmul.msk.f32.gmra.mxu0 %vm157_vm1, %v138_v63 }
  0xb6   :  { %2273 = vmatmul.msk.f32.gmra.mxu1 %vm407_vm2, %v373_v1 }
  0xb9   :  { %v284_v2 = vpop.f32.mrf.mxu0 }
  0xba   :  { %v285_v4 = vadd.f32 %v2946_v53, %v284_v2 }
  0xbc   :  { %v374_v5 = vmax.f32 %v285_v4, 0.0  ;;  %2258 = vmatmul.msk.f32.gmra.mxu0 %vm157_vm1, %v139_v3 }
  0xbe   :  { %2274 = vmatmul.msk.f32.gmra.mxu1 %vm407_vm2, %v374_v5 }
  0xc1   :  { %v287_v6 = vpop.f32.mrf.mxu0 }
  0xc2   :  { %v288_v8 = vadd.f32 %v2946_v53, %v287_v6 }
  0xc4   :  { %v375_v9 = vmax.f32 %v288_v8, 0.0  ;;  %2259 = vmatmul.msk.f32.gmra.mxu0 %vm157_vm1, %v140_v7 }
  0xc6   :  { %2275 = vmatmul.msk.f32.gmra.mxu1 %vm407_vm2, %v375_v9 }
  0xc9   :  { %v290_v10 = vpop.f32.mrf.mxu0 }
  0xca   :  { %v291_v12 = vadd.f32 %v2946_v53, %v290_v10 }
  0xcc   :  { %v376_v13 = vmax.f32 %v291_v12, 0.0  ;;  %2260 = vmatmul.msk.f32.gmra.mxu0 %vm157_vm1, %v141_v11 }
  0xce   :  { %2276 = vmatmul.msk.f32.gmra.mxu1 %vm407_vm2, %v376_v13 }
  0xd1   :  { %v293_v15 = vpop.f32.mrf.mxu0 }
  0xd2   :  { %v294_v17 = vadd.f32 %v2946_v53, %v293_v15 }
  0xd4   :  { %v377_v18 = vmax.f32 %v294_v17, 0.0  ;;  %2261 = vmatmul.msk.f32.gmra.mxu0 %vm157_vm1, %v142_v16 }
  0xd6   :  { %2277 = vmatmul.msk.f32.gmra.mxu1 %vm407_vm2, %v377_v18 }
  0xd9   :  { %v296_v20 = vpop.f32.mrf.mxu0 }
  0xda   :  { %v297_v22 = vadd.f32 %v2946_v53, %v296_v20 }
  0xdc   :  { %v378_v23 = vmax.f32 %v297_v22, 0.0  ;;  %2262 = vmatmul.msk.f32.gmra.mxu0 %vm157_vm1, %v143_v21 }
  0xde   :  { %2278 = vmatmul.msk.f32.gmra.mxu1 %vm407_vm2, %v378_v23 }
  0xe1   :  { %v299_v25 = vpop.f32.mrf.mxu0 }
  0xe2   :  { %v300_v27 = vadd.f32 %v2946_v53, %v299_v25 }
  0xe4   :  { %v379_v28 = vmax.f32 %v300_v27, 0.0  ;;  %2263 = vmatmul.msk.f32.gmra.mxu0 %vm157_vm1, %v144_v26 }
  0xe6   :  { %2279 = vmatmul.msk.f32.gmra.mxu1 %vm407_vm2, %v379_v28  ;;  %v353_v28 = vpop.f32.mrf.mxu3 }
  0xe7   :  { %v354_v38 = vadd.f32 %v2946_v53, %v353_v28 }
  0xe9   :  { %v302_v30 = vpop.f32.mrf.mxu0 }
  0xea   :  { %v303_v32 = vadd.f32 %v2946_v53, %v302_v30 }
  0xec   :  { %v380_v33 = vmax.f32 %v303_v32, 0.0  ;;  %2264 = vmatmul.msk.f32.gmra.mxu0 %vm157_vm1, %v145_v31 }
  0xee   :  { %2280 = vmatmul.msk.f32.gmra.mxu1 %vm407_vm2, %v380_v33 }
  0xf1   :  { %v305_v35 = vpop.f32.mrf.mxu0 }
  0xf2   :  { %v306_v36 = vadd.f32 %v2946_v53, %v305_v35  ;;  %v356_v35 = vpop.f32.mrf.mxu3 }
  0xf4   :  { %v381_v37 = vmax.f32 %v306_v36, 0.0 }
  0xf6   :  { %2281 = vmatmul.msk.f32.gmra.mxu1 %vm407_vm2, %v381_v37 }
  0xf9   :  { %v308_v39 = vpop.f32.mrf.mxu0 }
  0xfa   :  { %v309_v40 = vadd.f32 %v2946_v53, %v308_v39  ;;  %v397_v39 = vmax.f32 %v354_v38, 0.0 }
  0xfc   :  { %v382_v41 = vmax.f32 %v309_v40, 0.0 }
  0xfe   :  { %2282 = vmatmul.msk.f32.gmra.mxu1 %vm407_vm2, %v382_v41  ;;  %v359_v41 = vpop.f32.mrf.mxu3 }
 0x101   :  { %v311_v42 = vpop.f32.mrf.mxu0 }
 0x102   :  { %v312_v43 = vadd.f32 %v2946_v53, %v311_v42  ;;  %v357_v42 = vadd.f32 %v2946_v53, %v356_v35 }
 0x104   :  { %v383_v44 = vmax.f32 %v312_v43, 0.0  ;;  %v398_v43 = vmax.f32 %v357_v42, 0.0 }
 0x106   :  { %2283 = vmatmul.msk.f32.gmra.mxu1 %vm407_vm2, %v383_v44 }
 0x109   :  { %v314_v45 = vpop.f32.mrf.mxu0 }
 0x10a   :  { %v315_v46 = vadd.f32 %v2946_v53, %v314_v45 }
 0x10c   :  { %v384_v47 = vmax.f32 %v315_v46, 0.0  ;;  %v360_v46 = vadd.f32 %v2946_v53, %v359_v41 }
 0x10e   :  { %2284 = vmatmul.msk.f32.gmra.mxu1 %vm407_vm2, %v384_v47  ;;  %v362_v47 = vpop.f32.mrf.mxu3 }
 0x111   :  { %v317_v48 = vpop.f32.mrf.mxu0 }
 0x112   :  { %v318_v49 = vadd.f32 %v2946_v53, %v317_v48  ;;  %v399_v48 = vmax.f32 %v360_v46, 0.0 }
 0x114   :  { %v385_v50 = vmax.f32 %v318_v49, 0.0 }
 0x116   :  { %2285 = vmatmul.msk.f32.gmra.mxu1 %vm407_vm2, %v385_v50  ;;  %v363_v50 = vadd.f32 %v2946_v53, %v362_v47 }
 0x119   :  { %v320_v51 = vpop.f32.mrf.mxu0 }
 0x11a   :  { %v321_v52 = vadd.f32 %v2946_v53, %v320_v51  ;;  %v365_v51 = vpop.f32.mrf.mxu3 }
 0x11c   :  { %v386_v54 = vmax.f32 %v321_v52, 0.0  ;;  %v400_v52 = vmax.f32 %v363_v50, 0.0 }
 0x11e   :  { %2286 = vmatmul.msk.f32.gmra.mxu1 %vm407_vm2, %v386_v54 }
 0x121   :  { %v323_v55 = vpop.f32.mrf.mxu0 }
 0x122   :  { %v324_v56 = vadd.f32 %v2946_v53, %v323_v55 }
 0x123   :  { %v3045_v57 = vpop.f32.mrf.mxu1 }
 0x124   :  { %v387_v58 = vmax.f32 %v324_v56, 0.0  ;;  %v366_v56 = vadd.f32 %v2946_v53, %v365_v51 }
 0x126   :  { %2287 = vmatmul.msk.f32.gmra.mxu1 %vm407_vm2, %v387_v58  ;;  %v401_v58 = vmax.f32 %v366_v56, 0.0 }
 0x129   :  { %v326_v59 = vpop.f32.mrf.mxu0 }
 0x12a   :  { %v327_v60 = vadd.f32 %v2946_v53, %v326_v59 }
 0x12b   :  { %v3049_v61 = vpop.f32.mrf.mxu1 }
 0x12c   :  { %v388_v62 = vmax.f32 %v327_v60, 0.0  ;;  %v617_v63 = vpack.c.bf16 %v3049_v61, %v3045_v57  ;;  %v368_v60 = vpop.f32.mrf.mxu3 }
 0x12e   :  { %2288 = vmatmul.msk.f32.gmra.mxu1 %vm407_vm2, %v388_v62  ;;  %v369_v62 = vadd.f32 %v2946_v53, %v368_v60 }
 0x131   :  { %v329_v0 = vpop.f32.mrf.mxu0 }
 0x132   :  { %v330_v1 = vadd.f32 %v2946_v53, %v329_v0  ;;  %v402_v0 = vmax.f32 %v369_v62, 0.0 }
 0x133   :  { %v3055_v2 = vpop.f32.mrf.mxu1 }
 0x134   :  { %v389_v3 = vmax.f32 %v330_v1, 0.0 }
 0x136   :  { %2289 = vmatmul.msk.f32.gmra.mxu1 %vm407_vm2, %v389_v3 }
 0x139   :  { %v332_v4 = vpop.f32.mrf.mxu0 }
 0x13a   :  { %v333_v5 = vadd.f32 %v2946_v53, %v332_v4 }
 0x13b   :  { %v3059_v6 = vpop.f32.mrf.mxu1 }
 0x13c   :  { %v390_v7 = vmax.f32 %v333_v5, 0.0  ;;  %v618_v8 = vpack.c.bf16 %v3059_v6, %v3055_v2 }
 0x13e   :  { %2290 = vmatmul.msk.f32.gmra.mxu1 %vm407_vm2, %v390_v7 }
 0x141   :  { %v335_v9 = vpop.f32.mrf.mxu0 }
 0x142   :  { %v336_v10 = vadd.f32 %v2946_v53, %v335_v9 }
 0x143   :  { %v3065_v11 = vpop.f32.mrf.mxu1 }
 0x144   :  { %v391_v12 = vmax.f32 %v336_v10, 0.0 }
 0x146   :  { %2291 = vmatmul.msk.f32.gmra.mxu1 %vm407_vm2, %v391_v12 }
 0x149   :  { %v338_v13 = vpop.f32.mrf.mxu0 }
 0x14a   :  { %v339_v14 = vadd.f32 %v2946_v53, %v338_v13 }
 0x14b   :  { %v3069_v15 = vpop.f32.mrf.mxu1 }
 0x14c   :  { %v392_v16 = vmax.f32 %v339_v14, 0.0  ;;  %v619_v17 = vpack.c.bf16 %v3069_v15, %v3065_v11 }
 0x14e   :  { %2292 = vmatmul.msk.f32.gmra.mxu1 %vm407_vm2, %v392_v16 }
 0x151   :  { %v341_v18 = vpop.f32.mrf.mxu0 }
 0x152   :  { %v342_v19 = vadd.f32 %v2946_v53, %v341_v18 }
 0x153   :  { %v3075_v20 = vpop.f32.mrf.mxu1 }
 0x154   :  { %v393_v21 = vmax.f32 %v342_v19, 0.0 }
 0x156   :  { %2293 = vmatmul.msk.f32.gmra.mxu1 %vm407_vm2, %v393_v21 }
 0x159   :  { %v344_v22 = vpop.f32.mrf.mxu0 }
 0x15a   :  { %v345_v23 = vadd.f32 %v2946_v53, %v344_v22 }
 0x15b   :  { %v3079_v24 = vpop.f32.mrf.mxu1 }
 0x15c   :  { %v394_v25 = vmax.f32 %v345_v23, 0.0  ;;  %v620_v26 = vpack.c.bf16 %v3079_v24, %v3075_v20 }
 0x15e   :  { %2294 = vmatmul.msk.f32.gmra.mxu1 %vm407_vm2, %v394_v25 }
 0x161   :  { %v347_v27 = vpop.f32.mrf.mxu0 }
 0x162   :  { %v348_v29 = vadd.f32 %v2946_v53, %v347_v27 }
 0x163   :  { %v3085_v30 = vpop.f32.mrf.mxu1 }
 0x164   :  { %v395_v31 = vmax.f32 %v348_v29, 0.0 }
 0x166   :  { %2295 = vmatmul.msk.f32.gmra.mxu1 %vm407_vm2, %v395_v31 }
 0x169   :  { %v350_v32 = vpop.f32.mrf.mxu0 }
 0x16a   :  { %v351_v33 = vadd.f32 %v2946_v53, %v350_v32 }
 0x16b   :  { %v3089_v34 = vpop.f32.mrf.mxu1 }
 0x16c   :  { %v396_v36 = vmax.f32 %v351_v33, 0.0  ;;  %v621_v37 = vpack.c.bf16 %v3089_v34, %v3085_v30 }
 0x16e   :  { %2296 = vmatmul.msk.f32.vlgmr.msrb.gmra.mxu3 %vm407_vm2, %v396_v36 }
 0x173   :  { %v551_v40 = vpop.f32.mrf.mxu1 }
 0x176   :  { %2297 = vmatmul.msk.f32.gmra.mxu3 %vm407_vm2, %v397_v39 }
 0x17b   :  { %v554_v44 = vpop.f32.mrf.mxu1 }
 0x17c   :  { %v622_v45 = vpack.c.bf16 %v554_v44, %v551_v40 }
 0x17e   :  { %2298 = vmatmul.msk.f32.gmra.mxu3 %vm407_vm2, %v398_v43 }
 0x183   :  { %v557_v49 = vpop.f32.mrf.mxu1 }
 0x186   :  { %2299 = vmatmul.msk.f32.gmra.mxu3 %vm407_vm2, %v399_v48 }
 0x18b   :  { %v560_v54 = vpop.f32.mrf.mxu1 }
 0x18c   :  { %v623_v55 = vpack.c.bf16 %v560_v54, %v557_v49 }
 0x18e   :  { %2300 = vmatmul.msk.f32.gmra.mxu3 %vm407_vm2, %v400_v52 }
 0x193   :  { %v563_v59 = vpop.f32.mrf.mxu1 }
 0x196   :  { %2301 = vmatmul.msk.f32.gmra.mxu3 %vm407_vm2, %v401_v58 }
 0x19b   :  { %v566_v1 = vpop.f32.mrf.mxu1 }
 0x19c   :  { %v624_v3 = vpack.c.bf16 %v566_v1, %v563_v59 }
 0x19e   :  { %2302 = vmatmul.msk.f32.gmra.mxu3 %vm407_vm2, %v402_v0  ;;  %833 = vmatpush.bf16.msra.mxu2 %v624_v3 }
 0x1a3   :  { %v569_v4 = vpop.f32.mrf.mxu1 }
 0x1ab   :  { %v572_v5 = vpop.f32.mrf.mxu1 }
 0x1ac   :  { %v625_v7 = vpack.c.bf16 %v572_v5, %v569_v4 }
 0x1b3   :  { %v575_v9 = vpop.f32.mrf.mxu1 }
 0x1bb   :  { %v578_v10 = vpop.f32.mrf.mxu1 }
 0x1bc   :  { %v626_v12 = vpack.c.bf16 %v578_v10, %v575_v9 }
 0x1c3   :  { %v581_v13 = vpop.f32.mrf.mxu1 }
 0x1cb   :  { %v584_v14 = vpop.f32.mrf.mxu1 }
 0x1cc   :  { %v627_v16 = vpack.c.bf16 %v584_v14, %v581_v13 }
 0x1d3   :  { %v587_v18 = vpop.f32.mrf.mxu1 }
 0x1db   :  { %v590_v19 = vpop.f32.mrf.mxu1 }
 0x1dc   :  { %v628_v21 = vpack.c.bf16 %v590_v19, %v587_v18 }
 0x1e3   :  { %v593_v22 = vpop.f32.mrf.mxu1 }
 0x1f1   :  { %v596_v23 = vpop.f32.mrf.mxu3 }
 0x1f2   :  { %v629_v53 = vpack.c.bf16 %v596_v23, %v593_v22 }
 0x1f9   :  { %v599_v25 = vpop.f32.mrf.mxu3 }
 0x201   :  { %v602_v27 = vpop.f32.mrf.mxu3 }
 0x202   :  { %v630_v28 = vpack.c.bf16 %v602_v27, %v599_v25 }
 0x209   :  { %v605_v29 = vpop.f32.mrf.mxu3 }
 0x211   :  { %v608_v31 = vpop.f32.mrf.mxu3 }
 0x212   :  { %v631_v32 = vpack.c.bf16 %v608_v31, %v605_v29 }
 0x219   :  { %v611_v33 = vpop.f32.mrf.mxu3 }
 0x221   :  { %v614_v35 = vpop.f32.mrf.mxu3 }
 0x222   :  { %v632_v36 = vpack.c.bf16 %v614_v35, %v611_v33 }
 0x224   :  { %922 = vmatpush.bf16.msra.mxu3 %v632_v36 }
 0x225   :  { %2696 = dma.done.wait [#allocation3], 4096 }
 0x226   :  { %2697 = vsyncadd [#allocation3], 4294963200  ;;  %834 = vmatpush.bf16.msra.mxu2 %v623_v55  ;;  %v2305_v38 = vld [vmem:[#allocation2] sm:$0xf]  ;;  %v2529_v39 = vld [vmem:[#allocation2 + $0x4] sm:$0xf0] }
 0x227   :  { %v2528_v30 = vld [vmem:[#allocation2 + $0x4] sm:$0xf]  ;;  %v2307_v34 = vld [vmem:[#allocation2 + $0x8] sm:$0xf0]  ;;  %v2313_v11 = vld [vmem:[#allocation2 + $0x10] sm:$0xf] }
 0x228   :  { %923 = vmatpush.bf16.msra.mxu3 %v631_v32  ;;  %v3120_v40 = vor.u32 %v2528_v30, %v2307_v34  ;;  %v2531_v2 = vld [vmem:[#allocation2 + $0x14] sm:$0xf0]  ;;  %v2530_v6 = vld [vmem:[#allocation2 + $0x14] sm:$0xf]  ;;  %v2321_v20 = vld [vmem:[#allocation2 + $0x20] sm:$0xf] }
 0x229   :  { %v3127_v15 = vor.u32 %v2531_v2, %v2313_v11  ;;  %v2533_v57 = vld [vmem:[#allocation2 + $0x24] sm:$0xf0]  ;;  %v2532_v61 = vld [vmem:[#allocation2 + $0x24] sm:$0xf]  ;;  %v2329_v41 = vld [vmem:[#allocation2 + $0x30] sm:$0xf] }
 0x22a   :  { %835 = vmatpush.bf16.msra.mxu2 %v622_v45  ;;  %v3133_v24 = vor.u32 %v2533_v57, %v2321_v20  ;;  %v2535_v42 = vld [vmem:[#allocation2 + $0x34] sm:$0xf0]  ;;  %v2534_v43 = vld [vmem:[#allocation2 + $0x34] sm:$0xf]  ;;  %v2331_v44 = vld [vmem:[#allocation2 + $0x38] sm:$0xf0] }
 0x22b   :  { %v3139_v45 = vor.u32 %v2535_v42, %v2329_v41  ;;  %v3141_v46 = vor.u32 %v2534_v43, %v2331_v44  ;;  %v2337_v47 = vld [vmem:[#allocation2 + $0x40] sm:$0xf]  ;;  %v2537_v48 = vld [vmem:[#allocation2 + $0x44] sm:$0xf0]  ;;  %v2536_v49 = vld [vmem:[#allocation2 + $0x44] sm:$0xf] }
 0x22c   :  { %924 = vmatpush.bf16.msra.mxu3 %v630_v28  ;;  %v2339_v50 = vld [vmem:[#allocation2 + $0x48] sm:$0xf0]  ;;  %v3145_v51 = vor.u32 %v2537_v48, %v2337_v47  ;;  %v2345_v54 = vld [vmem:[#allocation2 + $0x50] sm:$0xf]  ;;  %v2539_v55 = vld [vmem:[#allocation2 + $0x54] sm:$0xf0] }
 0x22d   :  { %v3147_v52 = vor.u32 %v2536_v49, %v2339_v50  ;;  %v2538_v56 = vld [vmem:[#allocation2 + $0x54] sm:$0xf]  ;;  %v2347_v58 = vld [vmem:[#allocation2 + $0x58] sm:$0xf0]  ;;  %v3151_v59 = vor.u32 %v2539_v55, %v2345_v54  ;;  %v2353_v62 = vld [vmem:[#allocation2 + $0x60] sm:$0xf] }
 0x22e   :  { %836 = vmatpush.bf16.msra.mxu2 %v621_v37  ;;  %v3118_v37 = vor.u32 %v2529_v39, %v2305_v38  ;;  %v3153_v60 = vor.u32 %v2538_v56, %v2347_v58  ;;  %v2541_v0 = vld [vmem:[#allocation2 + $0x64] sm:$0xf0]  ;;  %v2540_v1 = vld [vmem:[#allocation2 + $0x64] sm:$0xf]  ;;  %v2355_v3 = vld [vmem:[#allocation2 + $0x68] sm:$0xf0] }
 0x22f   :  { %v3157_v4 = vor.u32 %v2541_v0, %v2353_v62  ;;  %v3159_v5 = vor.u32 %v2540_v1, %v2355_v3  ;;  %v1045_v9 = vld [vmem:[%s3627_s6 + $0x10] sm:$0xff]  ;;  %v1044_v10 = vld [vmem:[%s3627_s6 + $0x8] sm:$0xff]  ;;  %v1043_v13 = vld [vmem:[%s3627_s6] sm:$0xff]  ;;  %s2216_s28 = sshll.u32 %s3633_s12, 4  ;;  %s2701_s29 = smov 64   ;;  %s2217_s28 = int_to_ptr.hbm [resolvable:$true] %s2216_s28 }
 0x230   :  { %925 = vmatpush.bf16.msra.mxu3 %v629_v53  ;;  %v2543_v14 = vld [vmem:[#allocation2 + $0x74] sm:$0xf0]  ;;  %v2363_v18 = vld [vmem:[#allocation2 + $0x78] sm:$0xf0]  ;;  %v2369_v22 = vld [vmem:[#allocation2 + $0x80] sm:$0xf] }
 0x231   :  { %v2545_v23 = vld [vmem:[#allocation2 + $0x84] sm:$0xf0]  ;;  %v2544_v53 = vld [vmem:[#allocation2 + $0x84] sm:$0xf]  ;;  %v2371_v25 = vld [vmem:[#allocation2 + $0x88] sm:$0xf0] }
 0x232   :  { %837 = vmatpush.bf16.msra.mxu2 %v620_v26  ;;  %v3181_v27 = vor.u32 %v2545_v23, %v2369_v22  ;;  %v3183_v28 = vor.u32 %v2544_v53, %v2371_v25  ;;  %v3190_v29 = vld [vmem:[%s3626_s5] ss:$0 sm:$0xff]  ;;  %v2377_v38 = vld [vmem:[#allocation2 + $0x90] sm:$0xf]  ;;  %v2547_v39 = vld [vmem:[#allocation2 + $0x94] sm:$0xf0] }
 0x233   :  { %v2546_v30 = vld [vmem:[#allocation2 + $0x94] sm:$0xf]  ;;  %v2379_v34 = vld [vmem:[#allocation2 + $0x98] sm:$0xf0]  ;;  %v2385_v47 = vld [vmem:[#allocation2 + $0xa0] sm:$0xf] }
 0x234   :  { %926 = vmatpush.bf16.msra.mxu3 %v628_v21  ;;  %v3197_v20 = vor.u32 %v2546_v30, %v2379_v34  ;;  %v2549_v48 = vld [vmem:[#allocation2 + $0xa4] sm:$0xf0]  ;;  %v2548_v49 = vld [vmem:[#allocation2 + $0xa4] sm:$0xf]  ;;  %v2387_v50 = vld [vmem:[#allocation2 + $0xa8] sm:$0xf0] }
 0x235   :  { %v3205_v58 = vor.u32 %v2549_v48, %v2385_v47  ;;  %v3207_v62 = vor.u32 %v2548_v49, %v2387_v50  ;;  %v2401_v34 = vld [vmem:[#allocation2 + $0xc0] sm:$0xf] }
 0x236   :  { %838 = vmatpush.bf16.msra.mxu2 %v619_v17 }
 0x238   :  { %927 = vmatpush.bf16.msra.mxu3 %v627_v16  ;;  %v2542_v16 = vld [vmem:[#allocation2 + $0x74] sm:$0xf] }
 0x239   :  { %v3177_v21 = vor.u32 %v2542_v16, %v2363_v18  ;;  %v2550_v16 = vld [vmem:[#allocation2 + $0xb4] sm:$0xf]  ;;  %v2395_v18 = vld [vmem:[#allocation2 + $0xb8] sm:$0xf0] }
 0x23a   :  { %839 = vmatpush.bf16.msra.mxu2 %v618_v8  ;;  %v2315_v8 = vld [vmem:[#allocation2 + $0x18] sm:$0xf0] }
 0x23b   :  { %v3129_v17 = vor.u32 %v2530_v6, %v2315_v8  ;;  %v3195_v8 = vor.u32 %v2547_v39, %v2377_v38 }
 0x23c   :  { %928 = vmatpush.bf16.msra.mxu3 %v626_v12  ;;  %v2361_v12 = vld [vmem:[#allocation2 + $0x70] sm:$0xf] }
 0x23d   :  { %v3175_v19 = vor.u32 %v2543_v14, %v2361_v12  ;;  %v2551_v14 = vld [vmem:[#allocation2 + $0xb4] sm:$0xf0] }
 0x23e   :  { %840 = vmatpush.bf16.msra.mxu2 %v617_v63  ;;  %v2323_v63 = vld [vmem:[#allocation2 + $0x28] sm:$0xf0] }
 0x23f   :  { %v3135_v26 = vor.u32 %v2532_v61, %v2323_v63 }
 0x240   :  { %929 = vmatpush.bf16.msra.mxu3 %v625_v7  ;;  %v1046_v7 = vld [vmem:[%s3627_s6 + $0x18] sm:$0xff]  ;;  %s2702_s6 = smov 4  }
 0x241   :  { %841 = vmatmul.bf16.vlgmr.msra.gmra.mxu2 %v3118_v37  ;;  %1155 = vmatpush.msrb.mxu0 %v1046_v7 }
 0x243   :  { %930 = vmatmul.bf16.vlgmr.msra.gmra.mxu3 %v3120_v40  ;;  %1156 = vmatpush.msrb.mxu0 %v1045_v9 }
 0x245   :  { %1157 = vmatpush.msrb.mxu0 %v1044_v10 }
 0x247   :  { %1158 = vmatpush.msrb.mxu0 %v1043_v13  ;;  %v2393_v13 = vld [vmem:[#allocation2 + $0xb0] sm:$0xf] }
 0x248   :  { %v3215_v25 = vor.u32 %v2551_v14, %v2393_v13 }
 0x251   :  { %846 = vmatmul.bf16.gmra.mxu2 %v3127_v15 }
 0x253   :  { %935 = vmatmul.bf16.gmra.mxu3 %v3129_v17 }
 0x261   :  { %851 = vmatmul.bf16.gmra.mxu2 %v3133_v24 }
 0x263   :  { %940 = vmatmul.bf16.gmra.mxu3 %v3135_v26 }
 0x271   :  { %856 = vmatmul.bf16.gmra.mxu2 %v3139_v45 }
 0x273   :  { %945 = vmatmul.bf16.gmra.mxu3 %v3141_v46 }
 0x281   :  { %861 = vmatmul.bf16.gmra.mxu2 %v3145_v51 }
 0x283   :  { %950 = vmatmul.bf16.gmra.mxu3 %v3147_v52 }
 0x291   :  { %866 = vmatmul.bf16.gmra.mxu2 %v3151_v59 }
 0x293   :  { %955 = vmatmul.bf16.gmra.mxu3 %v3153_v60 }
 0x2a1   :  { %871 = vmatmul.bf16.gmra.mxu2 %v3157_v4 }
 0x2a3   :  { %960 = vmatmul.bf16.gmra.mxu3 %v3159_v5 }
 0x2b1   :  { %876 = vmatmul.bf16.gmra.mxu2 %v3175_v19 }
 0x2b3   :  { %965 = vmatmul.bf16.gmra.mxu3 %v3177_v21 }
 0x2c1   :  { %881 = vmatmul.bf16.gmra.mxu2 %v3181_v27 }
 0x2c3   :  { %970 = vmatmul.bf16.gmra.mxu3 %v3183_v28 }
 0x2c4   :  { %v842_v31 = vpop.f32.mrf.mxu2 }
 0x2c5   :  { %v843_v33 = vadd.f32 %v3190_v29, %v842_v31  ;;  %v3217_v31 = vor.u32 %v2550_v16, %v2395_v18 }
 0x2c6   :  { %v931_v32 = vpop.f32.mrf.mxu3 }
 0x2c7   :  { %v932_v35 = vadd.f32 %v931_v32, %v843_v33 }
 0x2c9   :  { %v1011_v36 = vmax.f32 %v932_v35, 0.0 }
 0x2cb   :  { %2431 = vmatmul.msk.f32.vlgmr.msrb.gmra.mxu0 %vm407_vm2, %v1011_v36 }
 0x2cc   :  { %v844_v11 = vpop.f32.mrf.mxu2 }
 0x2cd   :  { %v845_v6 = vadd.f32 %v3190_v29, %v844_v11  ;;  %v2553_v11 = vld [vmem:[#allocation2 + $0xc4] sm:$0xf0] }
 0x2ce   :  { %v933_v2 = vpop.f32.mrf.mxu3 }
 0x2cf   :  { %v934_v57 = vadd.f32 %v933_v2, %v845_v6  ;;  %v2552_v2 = vld [vmem:[#allocation2 + $0xc4] sm:$0xf]  ;;  %v2403_v6 = vld [vmem:[#allocation2 + $0xc8] sm:$0xf0] }
 0x2d1   :  { %886 = vmatmul.bf16.gmra.mxu2 %v3195_v8  ;;  %v1012_v61 = vmax.f32 %v934_v57, 0.0 }
 0x2d3   :  { %975 = vmatmul.bf16.gmra.mxu3 %v3197_v20  ;;  %2432 = vmatmul.msk.f32.gmra.mxu0 %vm407_vm2, %v1012_v61 }
 0x2d4   :  { %v847_v63 = vpop.f32.mrf.mxu2 }
 0x2d5   :  { %v848_v42 = vadd.f32 %v3190_v29, %v847_v63 }
 0x2d6   :  { %v936_v41 = vpop.f32.mrf.mxu3 }
 0x2d7   :  { %v937_v43 = vadd.f32 %v936_v41, %v848_v42  ;;  %v3225_v41 = vor.u32 %v2553_v11, %v2401_v34  ;;  %v3227_v42 = vor.u32 %v2552_v2, %v2403_v6 }
 0x2d9   :  { %v1013_v44 = vmax.f32 %v937_v43, 0.0 }
 0x2db   :  { %2433 = vmatmul.msk.f32.gmra.mxu0 %vm407_vm2, %v1013_v44 }
 0x2dc   :  { %v849_v54 = vpop.f32.mrf.mxu2 }
 0x2dd   :  { %v850_v56 = vadd.f32 %v3190_v29, %v849_v54 }
 0x2de   :  { %v938_v55 = vpop.f32.mrf.mxu3 }
 0x2df   :  { %v939_v0 = vadd.f32 %v938_v55, %v850_v56  ;;  %v2409_v55 = vld [vmem:[#allocation2 + $0xd0] sm:$0xf]  ;;  %v2555_v56 = vld [vmem:[#allocation2 + $0xd4] sm:$0xf0] }
 0x2e1   :  { %891 = vmatmul.bf16.gmra.mxu2 %v3205_v58  ;;  %v1014_v1 = vmax.f32 %v939_v0, 0.0  ;;  %v2554_v0 = vld [vmem:[#allocation2 + $0xd4] sm:$0xf] }
 0x2e3   :  { %980 = vmatmul.bf16.gmra.mxu3 %v3207_v62  ;;  %2434 = vmatmul.msk.f32.gmra.mxu0 %vm407_vm2, %v1014_v1  ;;  %v2411_v1 = vld [vmem:[#allocation2 + $0xd8] sm:$0xf0] }
 0x2e4   :  { %v852_v3 = vpop.f32.mrf.mxu2 }
 0x2e5   :  { %v853_v9 = vadd.f32 %v3190_v29, %v852_v3 }
 0x2e6   :  { %v941_v7 = vpop.f32.mrf.mxu3 }
 0x2e7   :  { %v942_v10 = vadd.f32 %v941_v7, %v853_v9 }
 0x2e9   :  { %v1015_v12 = vmax.f32 %v942_v10, 0.0  ;;  %v3235_v10 = vor.u32 %v2555_v56, %v2409_v55 }
 0x2eb   :  { %2435 = vmatmul.msk.f32.gmra.mxu0 %vm407_vm2, %v1015_v12  ;;  %v3237_v12 = vor.u32 %v2554_v0, %v2411_v1 }
 0x2ec   :  { %v854_v22 = vpop.f32.mrf.mxu2 }
 0x2ed   :  { %v855_v53 = vadd.f32 %v3190_v29, %v854_v22 }
 0x2ee   :  { %v943_v23 = vpop.f32.mrf.mxu3 }
 0x2ef   :  { %v944_v32 = vadd.f32 %v943_v23, %v855_v53 }
 0x2f1   :  { %896 = vmatmul.bf16.gmra.mxu2 %v3215_v25  ;;  %v1016_v33 = vmax.f32 %v944_v32, 0.0  ;;  %v2417_v32 = vld [vmem:[#allocation2 + $0xe0] sm:$0xf] }
 0x2f3   :  { %985 = vmatmul.bf16.gmra.mxu3 %v3217_v31  ;;  %2436 = vmatmul.msk.f32.gmra.mxu0 %vm407_vm2, %v1016_v33  ;;  %v2557_v33 = vld [vmem:[#allocation2 + $0xe4] sm:$0xf0] }
 0x2f4   :  { %v857_v35 = vpop.f32.mrf.mxu2  ;;  %v3245_v34 = vor.u32 %v2557_v33, %v2417_v32 }
 0x2f5   :  { %v858_v38 = vadd.f32 %v3190_v29, %v857_v35  ;;  %v2556_v35 = vld [vmem:[#allocation2 + $0xe4] sm:$0xf] }
 0x2f6   :  { %v946_v36 = vpop.f32.mrf.mxu3 }
 0x2f7   :  { %v947_v39 = vadd.f32 %v946_v36, %v858_v38  ;;  %v2419_v36 = vld [vmem:[#allocation2 + $0xe8] sm:$0xf0] }
 0x2f8   :  { %v3247_v11 = vor.u32 %v2556_v35, %v2419_v36 }
 0x2f9   :  { %v1017_v30 = vmax.f32 %v947_v39, 0.0 }
 0x2fb   :  { %2437 = vmatmul.msk.f32.gmra.mxu0 %vm407_vm2, %v1017_v30 }
 0x2fc   :  { %v859_v57 = vpop.f32.mrf.mxu2 }
 0x2fd   :  { %v860_v63 = vadd.f32 %v3190_v29, %v859_v57 }
 0x2fe   :  { %v948_v61 = vpop.f32.mrf.mxu3 }
 0x2ff   :  { %v949_v43 = vadd.f32 %v948_v61, %v860_v63 }
 0x301   :  { %901 = vmatmul.bf16.gmra.mxu2 %v3225_v41  ;;  %v1018_v44 = vmax.f32 %v949_v43, 0.0 }
 0x303   :  { %990 = vmatmul.bf16.gmra.mxu3 %v3227_v42  ;;  %2438 = vmatmul.msk.f32.gmra.mxu0 %vm407_vm2, %v1018_v44 }
 0x304   :  { %v862_v47 = vpop.f32.mrf.mxu2 }
 0x305   :  { %v863_v49 = vadd.f32 %v3190_v29, %v862_v47  ;;  %v2425_v47 = vld [vmem:[#allocation2 + $0xf0] sm:$0xf] }
 0x306   :  { %v951_v48 = vpop.f32.mrf.mxu3 }
 0x307   :  { %v952_v50 = vadd.f32 %v951_v48, %v863_v49  ;;  %v2559_v48 = vld [vmem:[#allocation2 + $0xf4] sm:$0xf0]  ;;  %v2558_v49 = vld [vmem:[#allocation2 + $0xf4] sm:$0xf] }
 0x308   :  { %v3255_v0 = vor.u32 %v2559_v48, %v2425_v47 }
 0x309   :  { %v1019_v54 = vmax.f32 %v952_v50, 0.0  ;;  %v2427_v50 = vld [vmem:[#allocation2 + $0xf8] sm:$0xf0] }
 0x30a   :  { %v3257_v1 = vor.u32 %v2558_v49, %v2427_v50 }
 0x30b   :  { %2439 = vmatmul.msk.f32.gmra.mxu0 %vm407_vm2, %v1019_v54 }
 0x30c   :  { %v864_v3 = vpop.f32.mrf.mxu2 }
 0x30d   :  { %v865_v9 = vadd.f32 %v3190_v29, %v864_v3 }
 0x30e   :  { %v953_v7 = vpop.f32.mrf.mxu3 }
 0x30f   :  { %v954_v13 = vadd.f32 %v953_v7, %v865_v9 }
 0x311   :  { %906 = vmatmul.bf16.gmra.mxu2 %v3235_v10  ;;  %v1020_v14 = vmax.f32 %v954_v13, 0.0 }
 0x313   :  { %995 = vmatmul.bf16.gmra.mxu3 %v3237_v12  ;;  %2440 = vmatmul.msk.f32.gmra.mxu0 %vm407_vm2, %v1020_v14 }
 0x314   :  { %v867_v16 = vpop.f32.mrf.mxu2 }
 0x315   :  { %v868_v22 = vadd.f32 %v3190_v29, %v867_v16 }
 0x316   :  { %v956_v18 = vpop.f32.mrf.mxu3 }
 0x317   :  { %v957_v23 = vadd.f32 %v956_v18, %v868_v22 }
 0x319   :  { %v1021_v53 = vmax.f32 %v957_v23, 0.0 }
 0x31b   :  { %2441 = vmatmul.msk.f32.gmra.mxu0 %vm407_vm2, %v1021_v53 }
 0x31c   :  { %v869_v38 = vpop.f32.mrf.mxu2 }
 0x31d   :  { %v870_v30 = vadd.f32 %v3190_v29, %v869_v38 }
 0x31e   :  { %v958_v39 = vpop.f32.mrf.mxu3 }
 0x31f   :  { %v959_v2 = vadd.f32 %v958_v39, %v870_v30 }
 0x321   :  { %911 = vmatmul.bf16.gmra.mxu2 %v3245_v34  ;;  %v1022_v6 = vmax.f32 %v959_v2, 0.0 }
 0x323   :  { %1000 = vmatmul.bf16.gmra.mxu3 %v3247_v11  ;;  %2442 = vmatmul.msk.f32.gmra.mxu0 %vm407_vm2, %v1022_v6 }
 0x324   :  { %v872_v57 = vpop.f32.mrf.mxu2 }
 0x325   :  { %v873_v63 = vadd.f32 %v3190_v29, %v872_v57 }
 0x326   :  { %v961_v61 = vpop.f32.mrf.mxu3 }
 0x327   :  { %v962_v43 = vadd.f32 %v961_v61, %v873_v63 }
 0x329   :  { %v1023_v44 = vmax.f32 %v962_v43, 0.0 }
 0x32b   :  { %2443 = vmatmul.msk.f32.gmra.mxu0 %vm407_vm2, %v1023_v44 }
 0x32c   :  { %v874_v54 = vpop.f32.mrf.mxu2 }
 0x32d   :  { %v875_v56 = vadd.f32 %v3190_v29, %v874_v54 }
 0x32e   :  { %v963_v55 = vpop.f32.mrf.mxu3 }
 0x32f   :  { %v964_v3 = vadd.f32 %v963_v55, %v875_v56 }
 0x331   :  { %916 = vmatmul.bf16.gmra.mxu2 %v3255_v0  ;;  %v1024_v7 = vmax.f32 %v964_v3, 0.0 }
 0x333   :  { %1005 = vmatmul.bf16.gmra.mxu3 %v3257_v1  ;;  %2444 = vmatmul.msk.f32.gmra.mxu0 %vm407_vm2, %v1024_v7 }
 0x334   :  { %v877_v9 = vpop.f32.mrf.mxu2 }
 0x335   :  { %v878_v14 = vadd.f32 %v3190_v29, %v877_v9 }
 0x336   :  { %v966_v13 = vpop.f32.mrf.mxu3 }
 0x337   :  { %v967_v16 = vadd.f32 %v966_v13, %v878_v14 }
 0x339   :  { %v1025_v18 = vmax.f32 %v967_v16, 0.0 }
 0x33b   :  { %2445 = vmatmul.msk.f32.gmra.mxu0 %vm407_vm2, %v1025_v18 }
 0x33c   :  { %v879_v22 = vpop.f32.mrf.mxu2 }
 0x33d   :  { %v880_v53 = vadd.f32 %v3190_v29, %v879_v22 }
 0x33e   :  { %v968_v23 = vpop.f32.mrf.mxu3 }
 0x33f   :  { %v969_v32 = vadd.f32 %v968_v23, %v880_v53 }
 0x341   :  { %v1026_v33 = vmax.f32 %v969_v32, 0.0 }
 0x343   :  { %2446 = vmatmul.msk.f32.gmra.mxu0 %vm407_vm2, %v1026_v33 }
 0x344   :  { %v882_v35 = vpop.f32.mrf.mxu2 }
 0x345   :  { %v883_v38 = vadd.f32 %v3190_v29, %v882_v35 }
 0x346   :  { %v971_v36 = vpop.f32.mrf.mxu3 }
 0x347   :  { %v972_v39 = vadd.f32 %v971_v36, %v883_v38 }
 0x348   :  { %v3267_v30 = vpop.f32.mrf.mxu0 }
 0x349   :  { %v1027_v2 = vmax.f32 %v972_v39, 0.0 }
 0x34b   :  { %2447 = vmatmul.msk.f32.gmra.mxu0 %vm407_vm2, %v1027_v2 }
 0x34c   :  { %v884_v6 = vpop.f32.mrf.mxu2 }
 0x34d   :  { %v885_v61 = vadd.f32 %v3190_v29, %v884_v6 }
 0x34e   :  { %v973_v57 = vpop.f32.mrf.mxu3 }
 0x34f   :  { %v974_v63 = vadd.f32 %v973_v57, %v885_v61 }
 0x350   :  { %v3271_v43 = vpop.f32.mrf.mxu0 }
 0x351   :  { %v1028_v44 = vmax.f32 %v974_v63, 0.0 }
 0x353   :  { %2448 = vmatmul.msk.f32.gmra.mxu0 %vm407_vm2, %v1028_v44 }
 0x354   :  { %v887_v47 = vpop.f32.mrf.mxu2 }
 0x355   :  { %v888_v49 = vadd.f32 %v3190_v29, %v887_v47 }
 0x356   :  { %v976_v48 = vpop.f32.mrf.mxu3 }
 0x357   :  { %v977_v50 = vadd.f32 %v976_v48, %v888_v49 }
 0x358   :  { %v3275_v54 = vpop.f32.mrf.mxu0 }
 0x359   :  { %v1029_v55 = vmax.f32 %v977_v50, 0.0 }
 0x35b   :  { %2449 = vmatmul.msk.f32.gmra.mxu0 %vm407_vm2, %v1029_v55 }
 0x35c   :  { %v889_v56 = vpop.f32.mrf.mxu2 }
 0x35d   :  { %v890_v7 = vadd.f32 %v3190_v29, %v889_v56 }
 0x35e   :  { %v978_v3 = vpop.f32.mrf.mxu3 }
 0x35f   :  { %v979_v9 = vadd.f32 %v978_v3, %v890_v7 }
 0x360   :  { %v3279_v13 = vpop.f32.mrf.mxu0 }
 0x361   :  { %v1030_v14 = vmax.f32 %v979_v9, 0.0 }
 0x363   :  { %2450 = vmatmul.msk.f32.gmra.mxu0 %vm407_vm2, %v1030_v14 }
 0x364   :  { %v892_v16 = vpop.f32.mrf.mxu2 }
 0x365   :  { %v893_v22 = vadd.f32 %v3190_v29, %v892_v16 }
 0x366   :  { %v981_v18 = vpop.f32.mrf.mxu3 }
 0x367   :  { %v982_v23 = vadd.f32 %v981_v18, %v893_v22 }
 0x368   :  { %v3283_v53 = vpop.f32.mrf.mxu0 }
 0x369   :  { %v1031_v32 = vmax.f32 %v982_v23, 0.0 }
 0x36b   :  { %2451 = vmatmul.msk.f32.gmra.mxu0 %vm407_vm2, %v1031_v32 }
 0x36c   :  { %v894_v33 = vpop.f32.mrf.mxu2 }
 0x36d   :  { %v895_v36 = vadd.f32 %v3190_v29, %v894_v33 }
 0x36e   :  { %v983_v35 = vpop.f32.mrf.mxu3 }
 0x36f   :  { %v984_v38 = vadd.f32 %v983_v35, %v895_v36 }
 0x370   :  { %v3287_v39 = vpop.f32.mrf.mxu0 }
 0x371   :  { %v1032_v2 = vmax.f32 %v984_v38, 0.0 }
 0x373   :  { %2452 = vmatmul.msk.f32.gmra.mxu0 %vm407_vm2, %v1032_v2 }
 0x374   :  { %v897_v6 = vpop.f32.mrf.mxu2 }
 0x375   :  { %v898_v61 = vadd.f32 %v3190_v29, %v897_v6 }
 0x376   :  { %v986_v57 = vpop.f32.mrf.mxu3 }
 0x377   :  { %v987_v63 = vadd.f32 %v986_v57, %v898_v61 }
 0x378   :  { %v3291_v44 = vpop.f32.mrf.mxu0 }
 0x379   :  { %v1033_v47 = vmax.f32 %v987_v63, 0.0 }
 0x37b   :  { %2453 = vmatmul.msk.f32.gmra.mxu0 %vm407_vm2, %v1033_v47 }
 0x37c   :  { %v899_v48 = vpop.f32.mrf.mxu2 }
 0x37d   :  { %v900_v50 = vadd.f32 %v3190_v29, %v899_v48 }
 0x37e   :  { %v988_v49 = vpop.f32.mrf.mxu3 }
 0x37f   :  { %v989_v55 = vadd.f32 %v988_v49, %v900_v50 }
 0x380   :  { %v3295_v56 = vpop.f32.mrf.mxu0 }
 0x381   :  { %v1034_v3 = vmax.f32 %v989_v55, 0.0 }
 0x383   :  { %2454 = vmatmul.msk.f32.gmra.mxu0 %vm407_vm2, %v1034_v3 }
 0x384   :  { %v902_v7 = vpop.f32.mrf.mxu2 }
 0x385   :  { %v903_v14 = vadd.f32 %v3190_v29, %v902_v7 }
 0x386   :  { %v991_v9 = vpop.f32.mrf.mxu3 }
 0x387   :  { %v992_v16 = vadd.f32 %v991_v9, %v903_v14 }
 0x388   :  { %v1184_v18 = vpop.f32.mrf.mxu0 }
 0x389   :  { %v1035_v22 = vmax.f32 %v992_v16, 0.0 }
 0x38b   :  { %2455 = vmatmul.msk.f32.gmra.mxu0 %vm407_vm2, %v1035_v22 }
 0x38c   :  { %v904_v23 = vpop.f32.mrf.mxu2 }
 0x38d   :  { %v905_v33 = vadd.f32 %v3190_v29, %v904_v23 }
 0x38e   :  { %v993_v32 = vpop.f32.mrf.mxu3 }
 0x38f   :  { %v994_v35 = vadd.f32 %v993_v32, %v905_v33 }
 0x390   :  { %v1187_v36 = vpop.f32.mrf.mxu0 }
 0x391   :  { %v1036_v38 = vmax.f32 %v994_v35, 0.0 }
 0x393   :  { %2456 = vmatmul.msk.f32.gmra.mxu0 %vm407_vm2, %v1036_v38 }
 0x394   :  { %v907_v2 = vpop.f32.mrf.mxu2 }
 0x395   :  { %v908_v57 = vadd.f32 %v3190_v29, %v907_v2 }
 0x396   :  { %v996_v6 = vpop.f32.mrf.mxu3 }
 0x397   :  { %v997_v61 = vadd.f32 %v996_v6, %v908_v57 }
 0x398   :  { %v1190_v63 = vpop.f32.mrf.mxu0 }
 0x399   :  { %v1037_v47 = vmax.f32 %v997_v61, 0.0 }
 0x39b   :  { %2457 = vmatmul.msk.f32.gmra.mxu0 %vm407_vm2, %v1037_v47 }
 0x39c   :  { %v909_v48 = vpop.f32.mrf.mxu2 }
 0x39d   :  { %v910_v50 = vadd.f32 %v3190_v29, %v909_v48 }
 0x39e   :  { %v998_v49 = vpop.f32.mrf.mxu3 }
 0x39f   :  { %v999_v55 = vadd.f32 %v998_v49, %v910_v50 }
 0x3a0   :  { %v1193_v3 = vpop.f32.mrf.mxu0 }
 0x3a1   :  { %v1038_v7 = vmax.f32 %v999_v55, 0.0 }
 0x3a3   :  { %2458 = vmatmul.msk.f32.gmra.mxu0 %vm407_vm2, %v1038_v7 }
 0x3a4   :  { %v912_v9 = vpop.f32.mrf.mxu2 }
 0x3a5   :  { %v913_v16 = vadd.f32 %v3190_v29, %v912_v9 }
 0x3a6   :  { %v1001_v14 = vpop.f32.mrf.mxu3 }
 0x3a7   :  { %v1002_v22 = vadd.f32 %v1001_v14, %v913_v16 }
 0x3a8   :  { %v1196_v23 = vpop.f32.mrf.mxu0 }
 0x3a9   :  { %v1039_v32 = vmax.f32 %v1002_v22, 0.0 }
 0x3ab   :  { %2459 = vmatmul.msk.f32.gmra.mxu0 %vm407_vm2, %v1039_v32 }
 0x3ac   :  { %v914_v33 = vpop.f32.mrf.mxu2 }
 0x3ad   :  { %v915_v38 = vadd.f32 %v3190_v29, %v914_v33 }
 0x3ae   :  { %v1003_v35 = vpop.f32.mrf.mxu3 }
 0x3af   :  { %v1004_v2 = vadd.f32 %v1003_v35, %v915_v38 }
 0x3b0   :  { %v1199_v6 = vpop.f32.mrf.mxu0 }
 0x3b1   :  { %v1040_v57 = vmax.f32 %v1004_v2, 0.0  ;;  %v1262_v35 = vpack.c.bf16 %v1199_v6, %v1196_v23  ;;  %v1261_v2 = vpack.c.bf16 %v1193_v3, %v1190_v63  ;;  %v1256_v63 = vpack.c.bf16 %v3271_v43, %v3267_v30 }
 0x3b3   :  { %2460 = vmatmul.msk.f32.gmra.mxu0 %vm407_vm2, %v1040_v57  ;;  %v1260_v57 = vpack.c.bf16 %v1187_v36, %v1184_v18 }
 0x3b4   :  { %v917_v61 = vpop.f32.mrf.mxu2 }
 0x3b5   :  { %v918_v48 = vadd.f32 %v3190_v29, %v917_v61 }
 0x3b6   :  { %v1006_v47 = vpop.f32.mrf.mxu3 }
 0x3b7   :  { %v1007_v49 = vadd.f32 %v1006_v47, %v918_v48  ;;  %v1259_v47 = vpack.c.bf16 %v3295_v56, %v3291_v44 }
 0x3b8   :  { %v1202_v50 = vpop.f32.mrf.mxu0 }
 0x3b9   :  { %v1041_v55 = vmax.f32 %v1007_v49, 0.0  ;;  %v1257_v49 = vpack.c.bf16 %v3279_v13, %v3275_v54 }
 0x3bb   :  { %2461 = vmatmul.msk.f32.gmra.mxu0 %vm407_vm2, %v1041_v55 }
 0x3bc   :  { %v919_v7 = vpop.f32.mrf.mxu2 }
 0x3bd   :  { %v920_v9 = vadd.f32 %v3190_v29, %v919_v7  ;;  %v1258_v29 = vpack.c.bf16 %v3287_v39, %v3283_v53 }
 0x3be   :  { %v1008_v14 = vpop.f32.mrf.mxu3 }
 0x3bf   :  { %v1009_v16 = vadd.f32 %v1008_v14, %v920_v9 }
 0x3c0   :  { %v1205_v22 = vpop.f32.mrf.mxu0 }
 0x3c1   :  { %v1042_v32 = vmax.f32 %v1009_v16, 0.0  ;;  %v1263_v33 = vpack.c.bf16 %v1205_v22, %v1202_v50 }
 0x3c3   :  { %2462 = vmatmul.msk.f32.gmra.mxu0 %vm407_vm2, %v1042_v32  ;;  %1276 = vmatpush.bf16.msrb.mxu1 %v1263_v33  ;;  %v1489_v33 = vld [vmem:[%s3629_s8 + $0x18] sm:$0xff] }
 0x3c4   :  { %1598 = vmatpush.msrb.mxu3 %v1489_v33 }
 0x3c7   :  { %1277 = vmatpush.bf16.msrb.mxu1 %v1262_v35 }
 0x3c8   :  { %v1208_v38 = vpop.f32.mrf.mxu0 }
 0x3cb   :  { %1278 = vmatpush.bf16.msrb.mxu1 %v1261_v2  ;;  %v1488_v2 = vld [vmem:[%s3629_s8 + $0x10] sm:$0xff] }
 0x3cc   :  { %1599 = vmatpush.msrb.mxu3 %v1488_v2 }
 0x3cf   :  { %1279 = vmatpush.bf16.msrb.mxu1 %v1260_v57  ;;  %v1487_v57 = vld [vmem:[%s3629_s8 + $0x8] sm:$0xff] }
 0x3d0   :  { %v1211_v61 = vpop.f32.mrf.mxu0  ;;  %1600 = vmatpush.msrb.mxu3 %v1487_v57 }
 0x3d1   :  { %v1264_v32 = vpack.c.bf16 %v1211_v61, %v1208_v38  ;;  %v1486_v61 = vld [vmem:[%s3629_s8] sm:$0xff] }
 0x3d2   :  { %1601 = vmatpush.msrb.mxu3 %v1486_v61 }
 0x3d3   :  { %1280 = vmatpush.bf16.msrb.mxu1 %v1259_v47 }
 0x3d7   :  { %1281 = vmatpush.bf16.msrb.mxu1 %v1258_v29 }
 0x3d8   :  { %v1214_v48 = vpop.f32.mrf.mxu0 }
 0x3db   :  { %1282 = vmatpush.bf16.msrb.mxu1 %v1257_v49  ;;  %v3359_v49 = vld [vmem:[%s3628_s7] ss:$0 sm:$0xff] }
 0x3df   :  { %1283 = vmatpush.bf16.msrb.mxu1 %v1256_v63 }
 0x3e0   :  { %v1217_v18 = vpop.f32.mrf.mxu0 }
 0x3e1   :  { %v1265_v22 = vpack.c.bf16 %v1217_v18, %v1214_v48 }
 0x3e2   :  { %1284 = vmatmul.bf16.vlgmr.msrb.gmra.mxu1 %v3118_v37 }
 0x3e8   :  { %v1220_v36 = vpop.f32.mrf.mxu0 }
 0x3f0   :  { %v1223_v3 = vpop.f32.mrf.mxu0 }
 0x3f1   :  { %v1266_v16 = vpack.c.bf16 %v1223_v3, %v1220_v36 }
 0x3f2   :  { %1289 = vmatmul.bf16.gmra.mxu1 %v3127_v15 }
 0x3f8   :  { %v1226_v44 = vpop.f32.mrf.mxu0 }
 0x400   :  { %v1229_v56 = vpop.f32.mrf.mxu0 }
 0x401   :  { %v1267_v14 = vpack.c.bf16 %v1229_v56, %v1226_v44 }
 0x402   :  { %1294 = vmatmul.bf16.gmra.mxu1 %v3133_v24 }
 0x408   :  { %v1232_v53 = vpop.f32.mrf.mxu0 }
 0x410   :  { %v1235_v39 = vpop.f32.mrf.mxu0 }
 0x411   :  { %v1268_v9 = vpack.c.bf16 %v1235_v39, %v1232_v53 }
 0x412   :  { %1299 = vmatmul.bf16.gmra.mxu1 %v3139_v45 }
 0x418   :  { %v1238_v54 = vpop.f32.mrf.mxu0 }
 0x420   :  { %v1241_v13 = vpop.f32.mrf.mxu0 }
 0x421   :  { %v1269_v7 = vpack.c.bf16 %v1241_v13, %v1238_v54 }
 0x422   :  { %1304 = vmatmul.bf16.gmra.mxu1 %v3145_v51 }
 0x428   :  { %v1244_v30 = vpop.f32.mrf.mxu0 }
 0x430   :  { %v1247_v43 = vpop.f32.mrf.mxu0 }
 0x431   :  { %v1270_v55 = vpack.c.bf16 %v1247_v43, %v1244_v30 }
 0x432   :  { %1309 = vmatmul.bf16.gmra.mxu1 %v3151_v59 }
 0x438   :  { %v1250_v23 = vpop.f32.mrf.mxu0 }
 0x440   :  { %v1253_v6 = vpop.f32.mrf.mxu0 }
 0x441   :  { %v1271_v50 = vpack.c.bf16 %v1253_v6, %v1250_v23 }
 0x442   :  { %1314 = vmatmul.bf16.gmra.mxu1 %v3157_v4 }
 0x443   :  { %1365 = vmatpush.bf16.msrb.mxu2 %v1271_v50 }
 0x447   :  { %1366 = vmatpush.bf16.msrb.mxu2 %v1270_v55 }
 0x44b   :  { %1367 = vmatpush.bf16.msrb.mxu2 %v1269_v7 }
 0x44f   :  { %1368 = vmatpush.bf16.msrb.mxu2 %v1268_v9 }
 0x452   :  { %1319 = vmatmul.bf16.gmra.mxu1 %v3175_v19 }
 0x453   :  { %1369 = vmatpush.bf16.msrb.mxu2 %v1267_v14 }
 0x457   :  { %1370 = vmatpush.bf16.msrb.mxu2 %v1266_v16 }
 0x45b   :  { %1371 = vmatpush.bf16.msrb.mxu2 %v1265_v22 }
 0x45f   :  { %1372 = vmatpush.bf16.msrb.mxu2 %v1264_v32  ;;  %v1285_v35 = vpop.f32.mrf.mxu1 }
 0x460   :  { %v1286_v63 = vadd.f32 %v3359_v49, %v1285_v35 }
 0x462   :  { %1373 = vmatmul.bf16.vlgmr.msrb.gmra.mxu2 %v3120_v40  ;;  %1324 = vmatmul.bf16.gmra.mxu1 %v3181_v27 }
 0x467   :  { %v1287_v38 = vpop.f32.mrf.mxu1 }
 0x468   :  { %v1288_v53 = vadd.f32 %v3359_v49, %v1287_v38 }
 0x46f   :  { %v1290_v47 = vpop.f32.mrf.mxu1 }
 0x470   :  { %v1291_v30 = vadd.f32 %v3359_v49, %v1290_v47 }
 0x472   :  { %1378 = vmatmul.bf16.gmra.mxu2 %v3129_v17  ;;  %1329 = vmatmul.bf16.gmra.mxu1 %v3195_v8 }
 0x477   :  { %v1292_v29 = vpop.f32.mrf.mxu1 }
 0x478   :  { %v1293_v7 = vadd.f32 %v3359_v49, %v1292_v29 }
 0x47f   :  { %v1295_v48 = vpop.f32.mrf.mxu1 }
 0x480   :  { %v1296_v22 = vadd.f32 %v3359_v49, %v1295_v48 }
 0x482   :  { %1383 = vmatmul.bf16.gmra.mxu2 %v3135_v26  ;;  %1334 = vmatmul.bf16.gmra.mxu1 %v3205_v58 }
 0x487   :  { %v1297_v18 = vpop.f32.mrf.mxu1 }
 0x488   :  { %v1298_v57 = vadd.f32 %v3359_v49, %v1297_v18 }
 0x48f   :  { %v1300_v56 = vpop.f32.mrf.mxu1 }
 0x492   :  { %1388 = vmatmul.bf16.gmra.mxu2 %v3141_v46  ;;  %1339 = vmatmul.bf16.gmra.mxu1 %v3215_v25 }
 0x497   :  { %v1302_v43 = vpop.f32.mrf.mxu1 }
 0x49f   :  { %v1305_v55 = vpop.f32.mrf.mxu1 }
 0x4a2   :  { %1393 = vmatmul.bf16.gmra.mxu2 %v3147_v52  ;;  %1344 = vmatmul.bf16.gmra.mxu1 %v3225_v41 }
 0x4a7   :  { %v1307_v32 = vpop.f32.mrf.mxu1 }
 0x4af   :  { %v1310_v2 = vpop.f32.mrf.mxu1 }
 0x4b2   :  { %1398 = vmatmul.bf16.gmra.mxu2 %v3153_v60  ;;  %1349 = vmatmul.bf16.gmra.mxu1 %v3235_v10 }
 0x4b7   :  { %v1312_v48 = vpop.f32.mrf.mxu1 }
 0x4c2   :  { %1403 = vmatmul.bf16.gmra.mxu2 %v3159_v5  ;;  %1354 = vmatmul.bf16.gmra.mxu1 %v3245_v34 }
 0x4d2   :  { %1408 = vmatmul.bf16.gmra.mxu2 %v3177_v21  ;;  %1359 = vmatmul.bf16.gmra.mxu1 %v3255_v0 }
 0x4e2   :  { %1413 = vmatmul.bf16.gmra.mxu2 %v3183_v28 }
 0x4e5   :  { %v1374_v36 = vpop.f32.mrf.mxu2 }
 0x4e6   :  { %v1375_v3 = vadd.f32 %v1374_v36, %v1286_v63  ;;  %v1301_v63 = vadd.f32 %v3359_v49, %v1300_v56 }
 0x4e8   :  { %v1454_v44 = vmax.f32 %v1375_v3, 0.0 }
 0x4ea   :  { %2463 = vmatmul.msk.f32.vlgmr.msrb.gmra.mxu3 %vm407_vm2, %v1454_v44 }
 0x4ed   :  { %v1376_v39 = vpop.f32.mrf.mxu2 }
 0x4ee   :  { %v1377_v54 = vadd.f32 %v1376_v39, %v1288_v53  ;;  %v1315_v53 = vpop.f32.mrf.mxu1  ;;  %v1303_v39 = vadd.f32 %v3359_v49, %v1302_v43 }
 0x4f0   :  { %v1455_v13 = vmax.f32 %v1377_v54, 0.0 }
 0x4f2   :  { %1418 = vmatmul.bf16.gmra.mxu2 %v3197_v20  ;;  %2464 = vmatmul.msk.f32.gmra.mxu3 %vm407_vm2, %v1455_v13 }
 0x4f5   :  { %v1379_v23 = vpop.f32.mrf.mxu2 }
 0x4f6   :  { %v1380_v6 = vadd.f32 %v1379_v23, %v1291_v30  ;;  %v1306_v30 = vadd.f32 %v3359_v49, %v1305_v55  ;;  %v1317_v56 = vpop.f32.mrf.mxu1 }
 0x4f8   :  { %v1456_v50 = vmax.f32 %v1380_v6, 0.0 }
 0x4fa   :  { %2465 = vmatmul.msk.f32.gmra.mxu3 %vm407_vm2, %v1456_v50 }
 0x4fd   :  { %v1381_v9 = vpop.f32.mrf.mxu2 }
 0x4fe   :  { %v1382_v14 = vadd.f32 %v1381_v9, %v1293_v7  ;;  %v1308_v7 = vadd.f32 %v3359_v49, %v1307_v32  ;;  %v1320_v43 = vpop.f32.mrf.mxu1 }
 0x500   :  { %v1457_v16 = vmax.f32 %v1382_v14, 0.0 }
 0x502   :  { %1423 = vmatmul.bf16.gmra.mxu2 %v3207_v62  ;;  %2466 = vmatmul.msk.f32.gmra.mxu3 %vm407_vm2, %v1457_v16 }
 0x505   :  { %v1384_v33 = vpop.f32.mrf.mxu2 }
 0x506   :  { %v1385_v35 = vadd.f32 %v1384_v33, %v1296_v22  ;;  %v1311_v22 = vadd.f32 %v3359_v49, %v1310_v2 }
 0x508   :  { %v1458_v38 = vmax.f32 %v1385_v35, 0.0 }
 0x50a   :  { %2467 = vmatmul.msk.f32.gmra.mxu3 %vm407_vm2, %v1458_v38  ;;  %v1322_v38 = vpop.f32.mrf.mxu1 }
 0x50d   :  { %v1386_v61 = vpop.f32.mrf.mxu2 }
 0x50e   :  { %v1387_v47 = vadd.f32 %v1386_v61, %v1298_v57  ;;  %v1313_v57 = vadd.f32 %v3359_v49, %v1312_v48 }
 0x510   :  { %v1459_v29 = vmax.f32 %v1387_v47, 0.0 }
 0x512   :  { %1428 = vmatmul.bf16.gmra.mxu2 %v3217_v31  ;;  %2468 = vmatmul.msk.f32.gmra.mxu3 %vm407_vm2, %v1459_v29  ;;  %v1316_v29 = vadd.f32 %v3359_v49, %v1315_v53  ;;  %v1325_v2 = vpop.f32.mrf.mxu1 }
 0x515   :  { %v1389_v36 = vpop.f32.mrf.mxu2 }
 0x516   :  { %v1390_v3 = vadd.f32 %v1389_v36, %v1301_v63 }
 0x518   :  { %v1460_v44 = vmax.f32 %v1390_v3, 0.0 }
 0x51a   :  { %2469 = vmatmul.msk.f32.gmra.mxu3 %vm407_vm2, %v1460_v44  ;;  %v1318_v44 = vadd.f32 %v3359_v49, %v1317_v56 }
 0x51d   :  { %v1391_v54 = vpop.f32.mrf.mxu2 }
 0x51e   :  { %v1392_v18 = vadd.f32 %v1391_v54, %v1303_v39  ;;  %v1327_v39 = vpop.f32.mrf.mxu1 }
 0x520   :  { %v1461_v13 = vmax.f32 %v1392_v18, 0.0 }
 0x522   :  { %1433 = vmatmul.bf16.gmra.mxu2 %v3227_v42  ;;  %2470 = vmatmul.msk.f32.gmra.mxu3 %vm407_vm2, %v1461_v13  ;;  %v1321_v13 = vadd.f32 %v3359_v49, %v1320_v43 }
 0x525   :  { %v1394_v23 = vpop.f32.mrf.mxu2 }
 0x526   :  { %v1395_v6 = vadd.f32 %v1394_v23, %v1306_v30  ;;  %v1330_v23 = vpop.f32.mrf.mxu1 }
 0x528   :  { %v1462_v50 = vmax.f32 %v1395_v6, 0.0 }
 0x52a   :  { %2471 = vmatmul.msk.f32.gmra.mxu3 %vm407_vm2, %v1462_v50  ;;  %v1323_v50 = vadd.f32 %v3359_v49, %v1322_v38 }
 0x52d   :  { %v1396_v9 = vpop.f32.mrf.mxu2 }
 0x52e   :  { %v1397_v14 = vadd.f32 %v1396_v9, %v1308_v7 }
 0x530   :  { %v1463_v16 = vmax.f32 %v1397_v14, 0.0  ;;  %v1332_v14 = vpop.f32.mrf.mxu1 }
 0x532   :  { %1438 = vmatmul.bf16.gmra.mxu2 %v3237_v12  ;;  %2472 = vmatmul.msk.f32.gmra.mxu3 %vm407_vm2, %v1463_v16  ;;  %v1326_v16 = vadd.f32 %v3359_v49, %v1325_v2 }
 0x535   :  { %v1399_v55 = vpop.f32.mrf.mxu2 }
 0x536   :  { %v1400_v33 = vadd.f32 %v1399_v55, %v1311_v22 }
 0x538   :  { %v1464_v35 = vmax.f32 %v1400_v33, 0.0  ;;  %v1335_v33 = vpop.f32.mrf.mxu1 }
 0x53a   :  { %2473 = vmatmul.msk.f32.gmra.mxu3 %vm407_vm2, %v1464_v35  ;;  %v1328_v35 = vadd.f32 %v3359_v49, %v1327_v39  ;;  %v1333_v39 = vadd.f32 %v3359_v49, %v1332_v14 }
 0x53d   :  { %v1401_v61 = vpop.f32.mrf.mxu2 }
 0x53e   :  { %v1402_v32 = vadd.f32 %v1401_v61, %v1313_v57 }
 0x540   :  { %v1465_v47 = vmax.f32 %v1402_v32, 0.0 }
 0x542   :  { %1443 = vmatmul.bf16.gmra.mxu2 %v3247_v11  ;;  %2474 = vmatmul.msk.f32.gmra.mxu3 %vm407_vm2, %v1465_v47  ;;  %v1331_v47 = vadd.f32 %v3359_v49, %v1330_v23 }
 0x545   :  { %v1404_v63 = vpop.f32.mrf.mxu2 }
 0x546   :  { %v1405_v36 = vadd.f32 %v1404_v63, %v1316_v29  ;;  %v1337_v29 = vpop.f32.mrf.mxu1 }
 0x547   :  { %v1338_v14 = vadd.f32 %v3359_v49, %v1337_v29 }
 0x548   :  { %v1466_v3 = vmax.f32 %v1405_v36, 0.0 }
 0x54a   :  { %2475 = vmatmul.msk.f32.gmra.mxu3 %vm407_vm2, %v1466_v3 }
 0x54d   :  { %v1406_v54 = vpop.f32.mrf.mxu2 }
 0x54e   :  { %v1407_v48 = vadd.f32 %v1406_v54, %v1318_v44 }
 0x550   :  { %v1467_v18 = vmax.f32 %v1407_v48, 0.0 }
 0x552   :  { %1448 = vmatmul.bf16.gmra.mxu2 %v3257_v1  ;;  %2476 = vmatmul.msk.f32.gmra.mxu3 %vm407_vm2, %v1467_v18 }
 0x555   :  { %v1409_v53 = vpop.f32.mrf.mxu2 }
 0x556   :  { %v1410_v30 = vadd.f32 %v1409_v53, %v1321_v13  ;;  %v1340_v13 = vpop.f32.mrf.mxu1 }
 0x558   :  { %v1468_v6 = vmax.f32 %v1410_v30, 0.0  ;;  %v1336_v30 = vadd.f32 %v3359_v49, %v1335_v33  ;;  %v1341_v33 = vadd.f32 %v3359_v49, %v1340_v13 }
 0x55a   :  { %2477 = vmatmul.msk.f32.gmra.mxu3 %vm407_vm2, %v1468_v6 }
 0x55d   :  { %v1411_v7 = vpop.f32.mrf.mxu2 }
 0x55e   :  { %v1412_v56 = vadd.f32 %v1411_v7, %v1323_v50 }
 0x560   :  { %v1469_v9 = vmax.f32 %v1412_v56, 0.0 }
 0x562   :  { %2478 = vmatmul.msk.f32.gmra.mxu3 %vm407_vm2, %v1469_v9  ;;  %v1342_v9 = vpop.f32.mrf.mxu1 }
 0x563   :  { %v1343_v29 = vadd.f32 %v3359_v49, %v1342_v9 }
 0x565   :  { %v1414_v43 = vpop.f32.mrf.mxu2 }
 0x566   :  { %v1415_v22 = vadd.f32 %v1414_v43, %v1326_v16 }
 0x568   :  { %v1470_v55 = vmax.f32 %v1415_v22, 0.0 }
 0x56a   :  { %2479 = vmatmul.msk.f32.gmra.mxu3 %vm407_vm2, %v1470_v55 }
 0x56d   :  { %v1416_v57 = vpop.f32.mrf.mxu2  ;;  %v3406_v61 = vpop.f32.mrf.mxu3 }
 0x56e   :  { %v1417_v38 = vadd.f32 %v1416_v57, %v1328_v35  ;;  %v1345_v35 = vpop.f32.mrf.mxu1 }
 0x56f   :  { %v1346_v13 = vadd.f32 %v3359_v49, %v1345_v35 }
 0x570   :  { %v1471_v32 = vmax.f32 %v1417_v38, 0.0 }
 0x572   :  { %2480 = vmatmul.msk.f32.gmra.mxu3 %vm407_vm2, %v1471_v32 }
 0x575   :  { %v1419_v2 = vpop.f32.mrf.mxu2  ;;  %v3410_v63 = vpop.f32.mrf.mxu3 }
 0x576   :  { %v1420_v36 = vadd.f32 %v1419_v2, %v1331_v47  ;;  %v1699_v3 = vpack.c.bf16 %v3410_v63, %v3406_v61 }
 0x578   :  { %v1472_v44 = vmax.f32 %v1420_v36, 0.0  ;;  %v1347_v36 = vpop.f32.mrf.mxu1 }
 0x579   :  { %v1348_v9 = vadd.f32 %v3359_v49, %v1347_v36 }
 0x57a   :  { %2481 = vmatmul.msk.f32.gmra.mxu3 %vm407_vm2, %v1472_v44 }
 0x57d   :  { %v1421_v54 = vpop.f32.mrf.mxu2  ;;  %v3416_v48 = vpop.f32.mrf.mxu3 }
 0x57e   :  { %v1422_v18 = vadd.f32 %v1421_v54, %v1333_v39 }
 0x580   :  { %v1473_v53 = vmax.f32 %v1422_v18, 0.0 }
 0x582   :  { %2482 = vmatmul.msk.f32.gmra.mxu3 %vm407_vm2, %v1473_v53 }
 0x585   :  { %v1424_v23 = vpop.f32.mrf.mxu2  ;;  %v3420_v6 = vpop.f32.mrf.mxu3 }
 0x586   :  { %v1425_v50 = vadd.f32 %v1424_v23, %v1336_v30  ;;  %v1700_v7 = vpack.c.bf16 %v3420_v6, %v3416_v48 }
 0x588   :  { %v1474_v56 = vmax.f32 %v1425_v50, 0.0  ;;  %v1350_v50 = vpop.f32.mrf.mxu1 }
 0x58a   :  { %2483 = vmatmul.msk.f32.gmra.mxu3 %vm407_vm2, %v1474_v56 }
 0x58d   :  { %v1426_v16 = vpop.f32.mrf.mxu2  ;;  %v3426_v43 = vpop.f32.mrf.mxu3 }
 0x58e   :  { %v1427_v22 = vadd.f32 %v1426_v16, %v1338_v14 }
 0x590   :  { %v1475_v55 = vmax.f32 %v1427_v22, 0.0  ;;  %v1352_v35 = vpop.f32.mrf.mxu1 }
 0x592   :  { %2484 = vmatmul.msk.f32.gmra.mxu3 %vm407_vm2, %v1475_v55 }
 0x595   :  { %v1429_v57 = vpop.f32.mrf.mxu2  ;;  %v3430_v38 = vpop.f32.mrf.mxu3 }
 0x596   :  { %v1430_v32 = vadd.f32 %v1429_v57, %v1341_v33  ;;  %v1701_v47 = vpack.c.bf16 %v3430_v38, %v3426_v43  ;;  %v1351_v57 = vadd.f32 %v3359_v49, %v1350_v50 }
 0x598   :  { %v1476_v2 = vmax.f32 %v1430_v32, 0.0 }
 0x59a   :  { %2485 = vmatmul.msk.f32.gmra.mxu3 %vm407_vm2, %v1476_v2 }
 0x59d   :  { %v1431_v44 = vpop.f32.mrf.mxu2  ;;  %v3436_v39 = vpop.f32.mrf.mxu3 }
 0x59e   :  { %v1432_v54 = vadd.f32 %v1431_v44, %v1343_v29 }
 0x5a0   :  { %v1477_v18 = vmax.f32 %v1432_v54, 0.0  ;;  %v1353_v54 = vadd.f32 %v3359_v49, %v1352_v35 }
 0x5a2   :  { %2486 = vmatmul.msk.f32.gmra.mxu3 %vm407_vm2, %v1477_v18 }
 0x5a5   :  { %v1434_v53 = vpop.f32.mrf.mxu2  ;;  %v3440_v30 = vpop.f32.mrf.mxu3 }
 0x5a6   :  { %v1435_v23 = vadd.f32 %v1434_v53, %v1346_v13  ;;  %v1702_v56 = vpack.c.bf16 %v3440_v30, %v3436_v39  ;;  %v1355_v39 = vpop.f32.mrf.mxu1 }
 0x5a7   :  { %v1356_v30 = vadd.f32 %v3359_v49, %v1355_v39 }
 0x5a8   :  { %v1478_v14 = vmax.f32 %v1435_v23, 0.0 }
 0x5aa   :  { %2487 = vmatmul.msk.f32.gmra.mxu3 %vm407_vm2, %v1478_v14 }
 0x5ad   :  { %v1436_v16 = vpop.f32.mrf.mxu2  ;;  %v1627_v22 = vpop.f32.mrf.mxu3 }
 0x5ae   :  { %v1437_v55 = vadd.f32 %v1436_v16, %v1348_v9  ;;  %v1357_v23 = vpop.f32.mrf.mxu1 }
 0x5b0   :  { %v1479_v33 = vmax.f32 %v1437_v55, 0.0  ;;  %v1358_v55 = vadd.f32 %v3359_v49, %v1357_v23 }
 0x5b2   :  { %2488 = vmatmul.msk.f32.gmra.mxu3 %vm407_vm2, %v1479_v33 }
 0x5b5   :  { %v1439_v32 = vpop.f32.mrf.mxu2  ;;  %v1630_v2 = vpop.f32.mrf.mxu3 }
 0x5b6   :  { %v1440_v29 = vadd.f32 %v1439_v32, %v1351_v57  ;;  %v1360_v32 = vpop.f32.mrf.mxu1 }
 0x5b8   :  { %v1480_v44 = vmax.f32 %v1440_v29, 0.0 }
 0x5ba   :  { %2489 = vmatmul.msk.f32.gmra.mxu3 %vm407_vm2, %v1480_v44  ;;  %v1361_v44 = vadd.f32 %v3359_v49, %v1360_v32 }
 0x5bd   :  { %v1441_v18 = vpop.f32.mrf.mxu2  ;;  %v1633_v36 = vpop.f32.mrf.mxu3 }
 0x5be   :  { %v1442_v13 = vadd.f32 %v1441_v18, %v1353_v54 }
 0x5c0   :  { %v1481_v53 = vmax.f32 %v1442_v13, 0.0 }
 0x5c2   :  { %2490 = vmatmul.msk.f32.gmra.mxu3 %vm407_vm2, %v1481_v53  ;;  %v1362_v53 = vpop.f32.mrf.mxu1 }
 0x5c5   :  { %v1444_v50 = vpop.f32.mrf.mxu2  ;;  %v1636_v14 = vpop.f32.mrf.mxu3 }
 0x5c6   :  { %v1445_v9 = vadd.f32 %v1444_v50, %v1356_v30  ;;  %v1363_v30 = vadd.f32 %v3359_v49, %v1362_v53 }
 0x5c8   :  { %v1482_v16 = vmax.f32 %v1445_v9, 0.0 }
 0x5ca   :  { %2491 = vmatmul.msk.f32.gmra.mxu3 %vm407_vm2, %v1482_v16 }
 0x5cd   :  { %v1446_v33 = vpop.f32.mrf.mxu2  ;;  %v1639_v57 = vpop.f32.mrf.mxu3 }
 0x5ce   :  { %v1447_v35 = vadd.f32 %v1446_v33, %v1358_v55 }
 0x5d0   :  { %v1483_v29 = vmax.f32 %v1447_v35, 0.0 }
 0x5d2   :  { %2492 = vmatmul.msk.f32.gmra.mxu3 %vm407_vm2, %v1483_v29  ;;  %v1704_v29 = vpack.c.bf16 %v1636_v14, %v1633_v36 }
 0x5d5   :  { %v1449_v39 = vpop.f32.mrf.mxu2  ;;  %v1642_v54 = vpop.f32.mrf.mxu3 }
 0x5d6   :  { %v1450_v18 = vadd.f32 %v1449_v39, %v1361_v44  ;;  %v1705_v35 = vpack.c.bf16 %v1642_v54, %v1639_v57  ;;  %v1703_v44 = vpack.c.bf16 %v1630_v2, %v1627_v22 }
 0x5d8   :  { %v1484_v13 = vmax.f32 %v1450_v18, 0.0 }
 0x5da   :  { %2493 = vmatmul.msk.f32.gmra.mxu3 %vm407_vm2, %v1484_v13 }
 0x5dd   :  { %v1451_v50 = vpop.f32.mrf.mxu2  ;;  %v1645_v23 = vpop.f32.mrf.mxu3 }
 0x5de   :  { %v1452_v9 = vadd.f32 %v1451_v50, %v1363_v30 }
 0x5e0   :  { %v1485_v16 = vmax.f32 %v1452_v9, 0.0 }
 0x5e2   :  { %2494 = vmatmul.msk.f32.gmra.mxu3 %vm407_vm2, %v1485_v16 }
 0x5e5   :  { %v1648_v55 = vpop.f32.mrf.mxu3 }
 0x5e6   :  { %v1706_v33 = vpack.c.bf16 %v1648_v55, %v1645_v23 }
 0x5e8   :  { %1719 = vmatpush.bf16.msra.mxu0 %v1706_v33 }
 0x5ec   :  { %1720 = vmatpush.bf16.msra.mxu0 %v1705_v35 }
 0x5ed   :  { %v1651_v32 = vpop.f32.mrf.mxu3 }
 0x5f0   :  { %1721 = vmatpush.bf16.msra.mxu0 %v1704_v29 }
 0x5f4   :  { %1722 = vmatpush.bf16.msra.mxu0 %v1703_v44 }
 0x5f5   :  { %v1654_v39 = vpop.f32.mrf.mxu3 }
 0x5f6   :  { %v1707_v18 = vpack.c.bf16 %v1654_v39, %v1651_v32 }
 0x5f8   :  { %1723 = vmatpush.bf16.msra.mxu0 %v1702_v56 }
 0x5fc   :  { %1724 = vmatpush.bf16.msra.mxu0 %v1701_v47 }
 0x5fd   :  { %v1657_v49 = vpop.f32.mrf.mxu3 }
 0x600   :  { %1725 = vmatpush.bf16.msra.mxu0 %v1700_v7 }
 0x604   :  { %1726 = vmatpush.bf16.msra.mxu0 %v1699_v3 }
 0x605   :  { %v1660_v57 = vpop.f32.mrf.mxu3 }
 0x606   :  { %v1708_v36 = vpack.c.bf16 %v1660_v57, %v1657_v49 }
 0x607   :  { %1727 = vmatmul.bf16.vlgmr.msra.gmra.mxu0 %v3118_v37 }
 0x60d   :  { %v1663_v22 = vpop.f32.mrf.mxu3 }
 0x615   :  { %v1666_v2 = vpop.f32.mrf.mxu3 }
 0x616   :  { %v1709_v56 = vpack.c.bf16 %v1666_v2, %v1663_v22 }
 0x617   :  { %1732 = vmatmul.bf16.gmra.mxu0 %v3127_v15  ;;  %v1932_v15 = vld [vmem:[%s3631_s10 + $0x18] sm:$0xff] }
 0x618   :  { %2045 = vmatpush.msra.mxu2 %v1932_v15  ;;  %2660 = vmatpush.msra.mxu3 %v1932_v15 }
 0x61d   :  { %v1669_v43 = vpop.f32.mrf.mxu3 }
 0x625   :  { %v1672_v38 = vpop.f32.mrf.mxu3 }
 0x626   :  { %v1710_v47 = vpack.c.bf16 %v1672_v38, %v1669_v43 }
 0x627   :  { %1737 = vmatmul.bf16.gmra.mxu0 %v3133_v24 }
 0x62d   :  { %v1675_v48 = vpop.f32.mrf.mxu3 }
 0x635   :  { %v1678_v6 = vpop.f32.mrf.mxu3 }
 0x637   :  { %1742 = vmatmul.bf16.gmra.mxu0 %v3139_v45 }
 0x63d   :  { %v1681_v61 = vpop.f32.mrf.mxu3 }
 0x645   :  { %v1684_v63 = vpop.f32.mrf.mxu3 }
 0x646   :  { %v1712_v54 = vpack.c.bf16 %v1684_v63, %v1681_v61 }
 0x647   :  { %1747 = vmatmul.bf16.gmra.mxu0 %v3145_v51  ;;  %v1711_v51 = vpack.c.bf16 %v1678_v6, %v1675_v48 }
 0x64d   :  { %v1687_v3 = vpop.f32.mrf.mxu3 }
 0x655   :  { %v1690_v37 = vpop.f32.mrf.mxu3 }
 0x656   :  { %v1713_v45 = vpack.c.bf16 %v1690_v37, %v1687_v3 }
 0x657   :  { %1752 = vmatmul.bf16.gmra.mxu0 %v3151_v59  ;;  %v1931_v59 = vld [vmem:[%s3631_s10 + $0x10] sm:$0xff] }
 0x658   :  { %2046 = vmatpush.msra.mxu2 %v1931_v59  ;;  %2661 = vmatpush.msra.mxu3 %v1931_v59 }
 0x65d   :  { %v1693_v7 = vpop.f32.mrf.mxu3 }
 0x665   :  { %v1696_v14 = vpop.f32.mrf.mxu3 }
 0x666   :  { %v1714_v24 = vpack.c.bf16 %v1696_v14, %v1693_v7 }
 0x667   :  { %1757 = vmatmul.bf16.gmra.mxu0 %v3157_v4  ;;  %v1930_v4 = vld [vmem:[%s3631_s10 + $0x8] sm:$0xff] }
 0x668   :  { %1808 = vmatpush.bf16.msra.mxu1 %v1714_v24  ;;  %2047 = vmatpush.msra.mxu2 %v1930_v4 }
 0x669   :  { %2662 = vmatpush.msra.mxu3 %v1930_v4 }
 0x66c   :  { %1809 = vmatpush.bf16.msra.mxu1 %v1713_v45 }
 0x670   :  { %1810 = vmatpush.bf16.msra.mxu1 %v1712_v54 }
 0x674   :  { %1811 = vmatpush.bf16.msra.mxu1 %v1711_v51 }
 0x677   :  { %1762 = vmatmul.bf16.gmra.mxu0 %v3175_v19 }
 0x678   :  { %1812 = vmatpush.bf16.msra.mxu1 %v1710_v47 }
 0x67c   :  { %1813 = vmatpush.bf16.msra.mxu1 %v1709_v56 }
 0x680   :  { %1814 = vmatpush.bf16.msra.mxu1 %v1708_v36 }
 0x684   :  { %1815 = vmatpush.bf16.msra.mxu1 %v1707_v18 }
 0x687   :  { %1816 = vmatmul.bf16.vlgmr.msra.gmra.mxu1 %v3120_v40  ;;  %1767 = vmatmul.bf16.gmra.mxu0 %v3181_v27  ;;  %v1728_v40 = vpop.f32.mrf.mxu0 }
 0x697   :  { %1821 = vmatmul.bf16.gmra.mxu1 %v3129_v17  ;;  %1772 = vmatmul.bf16.gmra.mxu0 %v3195_v8  ;;  %v1730_v17 = vpop.f32.mrf.mxu0 }
 0x6a7   :  { %1826 = vmatmul.bf16.gmra.mxu1 %v3135_v26  ;;  %1777 = vmatmul.bf16.gmra.mxu0 %v3205_v58  ;;  %v1929_v26 = vld [vmem:[%s3631_s10] sm:$0xff] }
 0x6a8   :  { %2048 = vmatpush.msra.mxu2 %v1929_v26  ;;  %2663 = vmatpush.msra.mxu3 %v1929_v26 }
 0x6b7   :  { %1831 = vmatmul.bf16.gmra.mxu1 %v3141_v46  ;;  %1782 = vmatmul.bf16.gmra.mxu0 %v3215_v25  ;;  %v1733_v46 = vpop.f32.mrf.mxu0 }
 0x6bf   :  { %v1735_v19 = vpop.f32.mrf.mxu0 }
 0x6c7   :  { %1836 = vmatmul.bf16.gmra.mxu1 %v3147_v52  ;;  %1787 = vmatmul.bf16.gmra.mxu0 %v3225_v41  ;;  %v1738_v52 = vpop.f32.mrf.mxu0 }
 0x6cf   :  { %v1740_v27 = vpop.f32.mrf.mxu0 }
 0x6d7   :  { %1841 = vmatmul.bf16.gmra.mxu1 %v3153_v60  ;;  %1792 = vmatmul.bf16.gmra.mxu0 %v3235_v10  ;;  %v3505_v60 = vld [vmem:[%s3630_s9] ss:$0 sm:$0xff]  ;;  %v1743_v41 = vpop.f32.mrf.mxu0 }
 0x6d8   :  { %v1734_v30 = vadd.f32 %v3505_v60, %v1733_v46  ;;  %v1736_v16 = vadd.f32 %v3505_v60, %v1735_v19  ;;  %v1739_v32 = vadd.f32 %v3505_v60, %v1738_v52  ;;  %v1741_v49 = vadd.f32 %v3505_v60, %v1740_v27 }
 0x6d9   :  { %v1744_v2 = vadd.f32 %v3505_v60, %v1743_v41 }
 0x6df   :  { %v1745_v50 = vpop.f32.mrf.mxu0 }
 0x6e0   :  { %v1746_v48 = vadd.f32 %v3505_v60, %v1745_v50 }
 0x6e7   :  { %1846 = vmatmul.bf16.gmra.mxu1 %v3159_v5  ;;  %v1729_v5 = vadd.f32 %v3505_v60, %v1728_v40  ;;  %1797 = vmatmul.bf16.gmra.mxu0 %v3245_v34 }
 0x6f7   :  { %1851 = vmatmul.bf16.gmra.mxu1 %v3177_v21  ;;  %v1731_v21 = vadd.f32 %v3505_v60, %v1730_v17  ;;  %1802 = vmatmul.bf16.gmra.mxu0 %v3255_v0 }
 0x704   :  { %v1817_v8 = vpop.f32.mrf.mxu1 }
 0x705   :  { %v1818_v58 = vadd.f32 %v1817_v8, %v1729_v5 }
 0x707   :  { %v1897_v25 = vmax.f32 %v1818_v58, 0.0  ;;  %1856 = vmatmul.bf16.gmra.mxu1 %v3183_v28  ;;  %v1748_v28 = vpop.f32.mrf.mxu0 }
 0x708   :  { %v1749_v3 = vadd.f32 %v3505_v60, %v1748_v28 }
 0x709   :  { %2495 = vmatmul.msk.f32.vlgmr.msra.gmra.mxu2 %vm407_vm2, %v1897_v25 }
 0x70c   :  { %v1819_v10 = vpop.f32.mrf.mxu1 }
 0x70d   :  { %v1820_v13 = vadd.f32 %v1819_v10, %v1731_v21 }
 0x70f   :  { %v1898_v53 = vmax.f32 %v1820_v13, 0.0  ;;  %v1750_v29 = vpop.f32.mrf.mxu0 }
 0x711   :  { %2496 = vmatmul.msk.f32.gmra.mxu2 %vm407_vm2, %v1898_v53 }
 0x714   :  { %v1822_v34 = vpop.f32.mrf.mxu1 }
 0x715   :  { %v1823_v23 = vadd.f32 %v1822_v34, %v1734_v30 }
 0x717   :  { %v1899_v9 = vmax.f32 %v1823_v23, 0.0  ;;  %1861 = vmatmul.bf16.gmra.mxu1 %v3197_v20  ;;  %v1753_v20 = vpop.f32.mrf.mxu0 }
 0x718   :  { %v1754_v59 = vadd.f32 %v3505_v60, %v1753_v20 }
 0x719   :  { %2497 = vmatmul.msk.f32.gmra.mxu2 %vm407_vm2, %v1899_v9 }
 0x71c   :  { %v1824_v55 = vpop.f32.mrf.mxu1 }
 0x71d   :  { %v1825_v33 = vadd.f32 %v1824_v55, %v1736_v16 }
 0x71f   :  { %v1900_v35 = vmax.f32 %v1825_v33, 0.0  ;;  %v1755_v56 = vpop.f32.mrf.mxu0 }
 0x721   :  { %2498 = vmatmul.msk.f32.gmra.mxu2 %vm407_vm2, %v1900_v35 }
 0x724   :  { %v1827_v44 = vpop.f32.mrf.mxu1 }
 0x725   :  { %v1828_v0 = vadd.f32 %v1827_v44, %v1739_v32 }
 0x727   :  { %v1901_v39 = vmax.f32 %v1828_v0, 0.0  ;;  %1866 = vmatmul.bf16.gmra.mxu1 %v3207_v62  ;;  %v1758_v62 = vpop.f32.mrf.mxu0 }
 0x728   :  { %v1759_v52 = vadd.f32 %v3505_v60, %v1758_v62 }
 0x729   :  { %2499 = vmatmul.msk.f32.gmra.mxu2 %vm407_vm2, %v1901_v39 }
 0x72c   :  { %v1829_v57 = vpop.f32.mrf.mxu1 }
 0x72d   :  { %v1830_v36 = vadd.f32 %v1829_v57, %v1741_v49  ;;  %v3555_v49 = vld [vmem:[%s3632_s11] ss:$0 sm:$0xff]  ;;  %s2700_s11 = smov [#allocation4]  }
 0x72e   :  { %s2214_s25 = sshll.u32 %s2700_s11, 4  ;;  %s2215_s25 = int_to_ptr.vmem [resolvable:$true] %s2214_s25 }
 0x72f   :  { %v1902_v22 = vmax.f32 %v1830_v36, 0.0  ;;  %v1760_v37 = vpop.f32.mrf.mxu0 }
 0x731   :  { %2500 = vmatmul.msk.f32.gmra.mxu2 %vm407_vm2, %v1902_v22 }
 0x734   :  { %v1832_v43 = vpop.f32.mrf.mxu1 }
 0x735   :  { %v1833_v38 = vadd.f32 %v1832_v43, %v1744_v2 }
 0x737   :  { %v1903_v47 = vmax.f32 %v1833_v38, 0.0  ;;  %1871 = vmatmul.bf16.gmra.mxu1 %v3217_v31  ;;  %v1751_v31 = vadd.f32 %v3505_v60, %v1750_v29  ;;  %v1763_v54 = vpop.f32.mrf.mxu0 }
 0x738   :  { %v1764_v13 = vadd.f32 %v3505_v60, %v1763_v54 }
 0x739   :  { %2501 = vmatmul.msk.f32.gmra.mxu2 %vm407_vm2, %v1903_v47 }
 0x73c   :  { %v1834_v6 = vpop.f32.mrf.mxu1 }
 0x73d   :  { %v1835_v61 = vadd.f32 %v1834_v6, %v1746_v48 }
 0x73f   :  { %v1904_v63 = vmax.f32 %v1835_v61, 0.0  ;;  %v1765_v17 = vpop.f32.mrf.mxu0 }
 0x741   :  { %2502 = vmatmul.msk.f32.gmra.mxu2 %vm407_vm2, %v1904_v63 }
 0x744   :  { %v1837_v7 = vpop.f32.mrf.mxu1 }
 0x745   :  { %v1838_v15 = vadd.f32 %v1837_v7, %v1749_v3 }
 0x747   :  { %v1905_v14 = vmax.f32 %v1838_v15, 0.0  ;;  %1876 = vmatmul.bf16.gmra.mxu1 %v3227_v42  ;;  %v1756_v42 = vadd.f32 %v3505_v60, %v1755_v56  ;;  %v1768_v5 = vpop.f32.mrf.mxu0 }
 0x748   :  { %v1769_v55 = vadd.f32 %v3505_v60, %v1768_v5 }
 0x749   :  { %2503 = vmatmul.msk.f32.gmra.mxu2 %vm407_vm2, %v1905_v14 }
 0x74c   :  { %v1839_v24 = vpop.f32.mrf.mxu1 }
 0x74d   :  { %v1840_v45 = vadd.f32 %v1839_v24, %v1751_v31 }
 0x74f   :  { %v1906_v51 = vmax.f32 %v1840_v45, 0.0  ;;  %v1770_v25 = vpop.f32.mrf.mxu0 }
 0x751   :  { %2504 = vmatmul.msk.f32.gmra.mxu2 %vm407_vm2, %v1906_v51 }
 0x754   :  { %v1842_v18 = vpop.f32.mrf.mxu1 }
 0x755   :  { %v1843_v4 = vadd.f32 %v1842_v18, %v1754_v59 }
 0x757   :  { %v1907_v40 = vmax.f32 %v1843_v4, 0.0  ;;  %1881 = vmatmul.bf16.gmra.mxu1 %v3237_v12  ;;  %v1761_v12 = vadd.f32 %v3505_v60, %v1760_v37  ;;  %v1773_v50 = vpop.f32.mrf.mxu0 }
 0x758   :  { %v1774_v57 = vadd.f32 %v3505_v60, %v1773_v50 }
 0x759   :  { %2505 = vmatmul.msk.f32.gmra.mxu2 %vm407_vm2, %v1907_v40 }
 0x75c   :  { %v1844_v26 = vpop.f32.mrf.mxu1 }
 0x75d   :  { %v1845_v46 = vadd.f32 %v1844_v26, %v1756_v42 }
 0x75f   :  { %v1908_v19 = vmax.f32 %v1845_v46, 0.0  ;;  %v1775_v16 = vpop.f32.mrf.mxu0 }
 0x760   :  { %v1776_v48 = vadd.f32 %v3505_v60, %v1775_v16 }
 0x761   :  { %2506 = vmatmul.msk.f32.gmra.mxu2 %vm407_vm2, %v1908_v19 }
 0x764   :  { %v1847_v27 = vpop.f32.mrf.mxu1 }
 0x765   :  { %v1848_v8 = vadd.f32 %v1847_v27, %v1759_v52 }
 0x767   :  { %v1909_v58 = vmax.f32 %v1848_v8, 0.0  ;;  %1886 = vmatmul.bf16.gmra.mxu1 %v3247_v11  ;;  %v1766_v11 = vadd.f32 %v3505_v60, %v1765_v17  ;;  %v1778_v29 = vpop.f32.mrf.mxu0 }
 0x768   :  { %v1779_v7 = vadd.f32 %v3505_v60, %v1778_v29 }
 0x769   :  { %2507 = vmatmul.msk.f32.gmra.mxu2 %vm407_vm2, %v1909_v58 }
 0x76c   :  { %v1849_v41 = vpop.f32.mrf.mxu1 }
 0x76d   :  { %v1850_v21 = vadd.f32 %v1849_v41, %v1761_v12 }
 0x76f   :  { %v1910_v10 = vmax.f32 %v1850_v21, 0.0  ;;  %v1780_v36 = vpop.f32.mrf.mxu0 }
 0x770   :  { %v1781_v18 = vadd.f32 %v3505_v60, %v1780_v36 }
 0x771   :  { %2508 = vmatmul.msk.f32.gmra.mxu2 %vm407_vm2, %v1910_v10 }
 0x774   :  { %v1852_v53 = vpop.f32.mrf.mxu1 }
 0x775   :  { %v1853_v30 = vadd.f32 %v1852_v53, %v1764_v13 }
 0x777   :  { %v1911_v34 = vmax.f32 %v1853_v30, 0.0  ;;  %1891 = vmatmul.bf16.gmra.mxu1 %v3257_v1  ;;  %v1771_v1 = vadd.f32 %v3505_v60, %v1770_v25  ;;  %v1783_v3 = vpop.f32.mrf.mxu0 }
 0x778   :  { %v1784_v26 = vadd.f32 %v3505_v60, %v1783_v3 }
 0x779   :  { %2509 = vmatmul.msk.f32.gmra.mxu2 %vm407_vm2, %v1911_v34 }
 0x77c   :  { %v1854_v23 = vpop.f32.mrf.mxu1 }
 0x77d   :  { %v1855_v9 = vadd.f32 %v1854_v23, %v1766_v11 }
 0x77f   :  { %v1912_v28 = vmax.f32 %v1855_v9, 0.0  ;;  %v1785_v59 = vpop.f32.mrf.mxu0 }
 0x780   :  { %v1786_v25 = vadd.f32 %v3505_v60, %v1785_v59 }
 0x781   :  { %2510 = vmatmul.msk.f32.gmra.mxu2 %vm407_vm2, %v1912_v28 }
 0x784   :  { %v1857_v33 = vpop.f32.mrf.mxu1 }
 0x785   :  { %v1858_v35 = vadd.f32 %v1857_v33, %v1769_v55 }
 0x787   :  { %v1913_v32 = vmax.f32 %v1858_v35, 0.0  ;;  %v1788_v46 = vpop.f32.mrf.mxu0 }
 0x788   :  { %v1789_v30 = vadd.f32 %v3505_v60, %v1788_v46 }
 0x789   :  { %2511 = vmatmul.msk.f32.gmra.mxu2 %vm407_vm2, %v1913_v32 }
 0x78c   :  { %v1859_v44 = vpop.f32.mrf.mxu1  ;;  %v2050_v0 = vpop.f32.mrf.mxu2 }
 0x78d   :  { %v1860_v39 = vadd.f32 %v1859_v44, %v1771_v1  ;;  %v2051_v56 = vadd.f32 %v3555_v49, %v2050_v0 }
 0x78f   :  { %v1914_v20 = vmax.f32 %v1860_v39, 0.0  ;;  %v1790_v41 = vpop.f32.mrf.mxu0 }
 0x790   :  { %v1791_v33 = vadd.f32 %v3505_v60, %v1790_v41 }
 0x791   :  { %2512 = vmatmul.msk.f32.gmra.mxu2 %vm407_vm2, %v1914_v20 }
 0x794   :  { %v1862_v22 = vpop.f32.mrf.mxu1  ;;  %v2053_v2 = vpop.f32.mrf.mxu2 }
 0x795   :  { %v1863_v43 = vadd.f32 %v1862_v22, %v1774_v57  ;;  %v2054_v38 = vadd.f32 %v3555_v49, %v2053_v2 }
 0x797   :  { %v1915_v47 = vmax.f32 %v1863_v43, 0.0  ;;  %v2563_v62 = vpack.c.bf16 %v2054_v38, %v2051_v56  ;;  %v1793_v28 = vpop.f32.mrf.mxu0 }
 0x798   :  { %v1794_v0 = vadd.f32 %v3505_v60, %v1793_v28 }
 0x799   :  { %2564 = vst [vmem:[#allocation4] sm:$0xff] %v2563_v62   ;;  %2513 = vmatmul.msk.f32.gmra.mxu2 %vm407_vm2, %v1915_v47 }
 0x79c   :  { %v1864_v6 = vpop.f32.mrf.mxu1  ;;  %v2056_v61 = vpop.f32.mrf.mxu2 }
 0x79d   :  { %v1865_v63 = vadd.f32 %v1864_v6, %v1776_v48  ;;  %v2057_v31 = vadd.f32 %v3555_v49, %v2056_v61 }
 0x79f   :  { %v1916_v37 = vmax.f32 %v1865_v63, 0.0  ;;  %v1795_v44 = vpop.f32.mrf.mxu0 }
 0x7a0   :  { %v1796_v38 = vadd.f32 %v3505_v60, %v1795_v44 }
 0x7a1   :  { %2514 = vmatmul.msk.f32.gmra.mxu2 %vm407_vm2, %v1916_v37 }
 0x7a4   :  { %v1867_v15 = vpop.f32.mrf.mxu1  ;;  %v2059_v14 = vpop.f32.mrf.mxu2 }
 0x7a5   :  { %v1868_v24 = vadd.f32 %v1867_v15, %v1779_v7  ;;  %v2060_v45 = vadd.f32 %v3555_v49, %v2059_v14 }
 0x7a7   :  { %v1917_v54 = vmax.f32 %v1868_v24, 0.0  ;;  %v2568_v51 = vpack.c.bf16 %v2060_v45, %v2057_v31  ;;  %v1798_v43 = vpop.f32.mrf.mxu0 }
 0x7a8   :  { %v1799_v61 = vadd.f32 %v3505_v60, %v1798_v43 }
 0x7a9   :  { %2640 = vst [vmem:[#allocation4 + $0x8] sm:$0xff] %v2568_v51   ;;  %2515 = vmatmul.msk.f32.gmra.mxu2 %vm407_vm2, %v1917_v54 }
 0x7ac   :  { %v1869_v4 = vpop.f32.mrf.mxu1  ;;  %v2062_v40 = vpop.f32.mrf.mxu2 }
 0x7ad   :  { %v1870_v17 = vadd.f32 %v1869_v4, %v1781_v18  ;;  %v2063_v5 = vadd.f32 %v3555_v49, %v2062_v40 }
 0x7af   :  { %v1918_v42 = vmax.f32 %v1870_v17, 0.0  ;;  %v1800_v63 = vpop.f32.mrf.mxu0 }
 0x7b0   :  { %v1801_v45 = vadd.f32 %v3505_v60, %v1800_v63 }
 0x7b1   :  { %2516 = vmatmul.msk.f32.gmra.mxu2 %vm407_vm2, %v1918_v42 }
 0x7b4   :  { %v1872_v19 = vpop.f32.mrf.mxu1  ;;  %v2065_v52 = vpop.f32.mrf.mxu2 }
 0x7b5   :  { %v1873_v27 = vadd.f32 %v1872_v19, %v1784_v26  ;;  %v2066_v8 = vadd.f32 %v3555_v49, %v2065_v52 }
 0x7b7   :  { %v1919_v58 = vmax.f32 %v1873_v27, 0.0  ;;  %v2573_v12 = vpack.c.bf16 %v2066_v8, %v2063_v5  ;;  %v1803_v18 = vpop.f32.mrf.mxu0 }
 0x7b8   :  { %v1804_v40 = vadd.f32 %v3505_v60, %v1803_v18 }
 0x7b9   :  { %2641 = vst [vmem:[#allocation4 + $0x10] sm:$0xff] %v2573_v12   ;;  %2517 = vmatmul.msk.f32.vlgmr.msra.gmra.mxu3 %vm407_vm2, %v1919_v58 }
 0x7bc   :  { %v1874_v21 = vpop.f32.mrf.mxu1  ;;  %v2068_v10 = vpop.f32.mrf.mxu2 }
 0x7bd   :  { %v1875_v13 = vadd.f32 %v1874_v21, %v1786_v25  ;;  %v2069_v11 = vadd.f32 %v3555_v49, %v2068_v10 }
 0x7bf   :  { %v1920_v53 = vmax.f32 %v1875_v13, 0.0  ;;  %v1805_v27 = vpop.f32.mrf.mxu0 }
 0x7c0   :  { %v1806_v8 = vadd.f32 %v3505_v60, %v1805_v27 }
 0x7c1   :  { %2518 = vmatmul.msk.f32.gmra.mxu3 %vm407_vm2, %v1920_v53 }
 0x7c4   :  { %v1877_v50 = vpop.f32.mrf.mxu1  ;;  %v2071_v34 = vpop.f32.mrf.mxu2 }
 0x7c5   :  { %v1878_v23 = vadd.f32 %v1877_v50, %v1789_v30  ;;  %v2072_v9 = vadd.f32 %v3555_v49, %v2071_v34 }
 0x7c7   :  { %v1921_v16 = vmax.f32 %v1878_v23, 0.0  ;;  %v2578_v55 = vpack.c.bf16 %v2072_v9, %v2069_v11 }
 0x7c9   :  { %2642 = vst [vmem:[#allocation4 + $0x18] sm:$0xff] %v2578_v55   ;;  %2519 = vmatmul.msk.f32.gmra.mxu3 %vm407_vm2, %v1921_v16 }
 0x7cc   :  { %v1879_v35 = vpop.f32.mrf.mxu1  ;;  %v2074_v32 = vpop.f32.mrf.mxu2 }
 0x7cd   :  { %v1880_v29 = vadd.f32 %v1879_v35, %v1791_v33  ;;  %v2075_v57 = vadd.f32 %v3555_v49, %v2074_v32 }
 0x7cf   :  { %v1922_v1 = vmax.f32 %v1880_v29, 0.0 }
 0x7d1   :  { %2520 = vmatmul.msk.f32.gmra.mxu3 %vm407_vm2, %v1922_v1 }
 0x7d4   :  { %v1882_v39 = vpop.f32.mrf.mxu1  ;;  %v2077_v20 = vpop.f32.mrf.mxu2 }
 0x7d5   :  { %v1883_v36 = vadd.f32 %v1882_v39, %v1794_v0  ;;  %v2078_v22 = vadd.f32 %v3555_v49, %v2077_v20 }
 0x7d7   :  { %v1923_v2 = vmax.f32 %v1883_v36, 0.0  ;;  %v2583_v56 = vpack.c.bf16 %v2078_v22, %v2075_v57 }
 0x7d9   :  { %2643 = vst [vmem:[#allocation4 + $0x20] sm:$0xff] %v2583_v56   ;;  %2521 = vmatmul.msk.f32.gmra.mxu3 %vm407_vm2, %v1923_v2 }
 0x7dc   :  { %v1884_v47 = vpop.f32.mrf.mxu1  ;;  %v2080_v62 = vpop.f32.mrf.mxu2 }
 0x7dd   :  { %v1885_v48 = vadd.f32 %v1884_v47, %v1796_v38  ;;  %v2081_v7 = vadd.f32 %v3555_v49, %v2080_v62 }
 0x7df   :  { %v1924_v6 = vmax.f32 %v1885_v48, 0.0 }
 0x7e1   :  { %2522 = vmatmul.msk.f32.gmra.mxu3 %vm407_vm2, %v1924_v6 }
 0x7e4   :  { %v1887_v3 = vpop.f32.mrf.mxu1  ;;  %v2083_v37 = vpop.f32.mrf.mxu2 }
 0x7e5   :  { %v1888_v15 = vadd.f32 %v1887_v3, %v1799_v61  ;;  %v2084_v14 = vadd.f32 %v3555_v49, %v2083_v37 }
 0x7e7   :  { %v1925_v31 = vmax.f32 %v1888_v15, 0.0  ;;  %v2588_v24 = vpack.c.bf16 %v2084_v14, %v2081_v7 }
 0x7e9   :  { %2644 = vst [vmem:[#allocation4 + $0x28] sm:$0xff] %v2588_v24   ;;  %2523 = vmatmul.msk.f32.gmra.mxu3 %vm407_vm2, %v1925_v31 }
 0x7ec   :  { %v1889_v54 = vpop.f32.mrf.mxu1  ;;  %v2086_v51 = vpop.f32.mrf.mxu2 }
 0x7ed   :  { %v1890_v59 = vadd.f32 %v1889_v54, %v1801_v45  ;;  %v2087_v26 = vadd.f32 %v3555_v49, %v2086_v51 }
 0x7ef   :  { %v1926_v4 = vmax.f32 %v1890_v59, 0.0 }
 0x7f1   :  { %2524 = vmatmul.msk.f32.gmra.mxu3 %vm407_vm2, %v1926_v4 }
 0x7f4   :  { %v1892_v17 = vpop.f32.mrf.mxu1  ;;  %v2089_v42 = vpop.f32.mrf.mxu2 }
 0x7f5   :  { %v1893_v46 = vadd.f32 %v1892_v17, %v1804_v40  ;;  %v2090_v19 = vadd.f32 %v3555_v49, %v2089_v42 }
 0x7f7   :  { %v1927_v52 = vmax.f32 %v1893_v46, 0.0  ;;  %v2593_v5 = vpack.c.bf16 %v2090_v19, %v2087_v26 }
 0x7f9   :  { %2645 = vst [vmem:[#allocation4 + $0x30] sm:$0xff] %v2593_v5   ;;  %2525 = vmatmul.msk.f32.gmra.mxu3 %vm407_vm2, %v1927_v52 }
 0x7fc   :  { %v1894_v58 = vpop.f32.mrf.mxu1  ;;  %v2092_v12 = vpop.f32.mrf.mxu2 }
 0x7fd   :  { %v1895_v25 = vadd.f32 %v1894_v58, %v1806_v8  ;;  %v2093_v10 = vadd.f32 %v3555_v49, %v2092_v12 }
 0x7ff   :  { %v1928_v41 = vmax.f32 %v1895_v25, 0.0 }
 0x801   :  { %2526 = vmatmul.msk.f32.gmra.mxu3 %vm407_vm2, %v1928_v41 }
 0x804   :  { %v2095_v21 = vpop.f32.mrf.mxu2 }
 0x805   :  { %v2096_v13 = vadd.f32 %v3555_v49, %v2095_v21 }
 0x807   :  { %v2598_v53 = vpack.c.bf16 %v2096_v13, %v2093_v10 }
 0x809   :  { %2646 = vst [vmem:[#allocation4 + $0x38] sm:$0xff] %v2598_v53  }
 0x80c   :  { %v2098_v30 = vpop.f32.mrf.mxu2 }
 0x80d   :  { %v2099_v34 = vadd.f32 %v3555_v49, %v2098_v30 }
 0x814   :  { %v2101_v50 = vpop.f32.mrf.mxu2 }
 0x815   :  { %v2102_v11 = vadd.f32 %v3555_v49, %v2101_v50 }
 0x817   :  { %v2603_v60 = vpack.c.bf16 %v2102_v11, %v2099_v34 }
 0x819   :  { %2647 = vst [vmem:[#allocation4 + $0x40] sm:$0xff] %v2603_v60  }
 0x81c   :  { %v2104_v23 = vpop.f32.mrf.mxu2 }
 0x81d   :  { %v2105_v28 = vadd.f32 %v3555_v49, %v2104_v23 }
 0x824   :  { %v2107_v9 = vpop.f32.mrf.mxu2 }
 0x825   :  { %v2108_v16 = vadd.f32 %v3555_v49, %v2107_v9 }
 0x827   :  { %v2608_v55 = vpack.c.bf16 %v2108_v16, %v2105_v28 }
 0x829   :  { %2648 = vst [vmem:[#allocation4 + $0x48] sm:$0xff] %v2608_v55  }
 0x82c   :  { %v2110_v33 = vpop.f32.mrf.mxu2 }
 0x82d   :  { %v2111_v32 = vadd.f32 %v3555_v49, %v2110_v33 }
 0x834   :  { %v2113_v35 = vpop.f32.mrf.mxu2 }
 0x835   :  { %v2114_v29 = vadd.f32 %v3555_v49, %v2113_v35 }
 0x837   :  { %v2613_v1 = vpack.c.bf16 %v2114_v29, %v2111_v32 }
 0x839   :  { %2649 = vst [vmem:[#allocation4 + $0x50] sm:$0xff] %v2613_v1  }
 0x83c   :  { %v2116_v44 = vpop.f32.mrf.mxu3 }
 0x83d   :  { %v2117_v39 = vadd.f32 %v3555_v49, %v2116_v44 }
 0x844   :  { %v2119_v0 = vpop.f32.mrf.mxu3 }
 0x845   :  { %v2120_v20 = vadd.f32 %v3555_v49, %v2119_v0 }
 0x847   :  { %v2618_v57 = vpack.c.bf16 %v2120_v20, %v2117_v39 }
 0x849   :  { %2650 = vst [vmem:[#allocation4 + $0x58] sm:$0xff] %v2618_v57  }
 0x84c   :  { %v2122_v36 = vpop.f32.mrf.mxu3 }
 0x84d   :  { %v2123_v2 = vadd.f32 %v3555_v49, %v2122_v36 }
 0x854   :  { %v2125_v22 = vpop.f32.mrf.mxu3 }
 0x855   :  { %v2126_v56 = vadd.f32 %v3555_v49, %v2125_v22 }
 0x857   :  { %v2623_v43 = vpack.c.bf16 %v2126_v56, %v2123_v2 }
 0x859   :  { %2651 = vst [vmem:[#allocation4 + $0x60] sm:$0xff] %v2623_v43  }
 0x85c   :  { %v2128_v38 = vpop.f32.mrf.mxu3 }
 0x85d   :  { %v2129_v62 = vadd.f32 %v3555_v49, %v2128_v38 }
 0x864   :  { %v2131_v47 = vpop.f32.mrf.mxu3 }
 0x865   :  { %v2132_v48 = vadd.f32 %v3555_v49, %v2131_v47 }
 0x867   :  { %v2628_v6 = vpack.c.bf16 %v2132_v48, %v2129_v62 }
 0x869   :  { %2652 = vst [vmem:[#allocation4 + $0x68] sm:$0xff] %v2628_v6  }
 0x86c   :  { %v2134_v61 = vpop.f32.mrf.mxu3 }
 0x86d   :  { %v2135_v3 = vadd.f32 %v3555_v49, %v2134_v61 }
 0x874   :  { %v2137_v63 = vpop.f32.mrf.mxu3 }
 0x875   :  { %v2138_v37 = vadd.f32 %v3555_v49, %v2137_v63 }
 0x877   :  { %v2633_v7 = vpack.c.bf16 %v2138_v37, %v2135_v3 }
 0x879   :  { %2653 = vst [vmem:[#allocation4 + $0x70] sm:$0xff] %v2633_v7  }
 0x87c   :  { %v2140_v15 = vpop.f32.mrf.mxu3 }
 0x87d   :  { %v2141_v31 = vadd.f32 %v3555_v49, %v2140_v15 }
 0x884   :  { %v2143_v14 = vpop.f32.mrf.mxu3 }
 0x885   :  { %v2144_v24 = vadd.f32 %v3555_v49, %v2143_v14 }
 0x887   :  { %v2638_v45 = vpack.c.bf16 %v2144_v24, %v2141_v31 }
 0x889   :  { %2654 = vst [vmem:[#allocation4 + $0x78] sm:$0xff] %v2638_v45  }
 0x88a   :  { %2222 = dma.vmem_to_hbm [thread:$0]  %s2215_s25, 2048, %s2217_s28, [#allocation5], %s2701_s29, %s2701_s29, %s2702_s6  }
 0x88b   :  { %2698 = dma.done.wait [#allocation5], 2048  }
 0x88c   :  { %2699 = vsyncadd [#allocation5], 4294965248 }
 0x88d   :  { %2227 = vsyncpa [#allocation5], 1 }
 0x88e   :  { %2228 = vsyncmov [#allocation3] }
 0x891   :  { %s2229_s30 = vpop.sfrf %2228 }
 0x892   :  { %p2527_p0 = scmp.ne.s32.totalorder %s2229_s30, 0 }
 0x894   :  { %2233 = shalt.err (%p2527_p0)  }

</bundles_post_ra>
